<compile_context>
chip_gen: v6e
topology: v6e:2x2x1
jax: 0.10.0
libtpu: 0.0.40
codegen_flags: <defaults>
</compile_context>

<pallas_src>
import functools

import jax
import jax.numpy as jnp
from jax.experimental import pallas as pl
from jax.experimental.pallas import tpu as pltpu

BN_EPS = 1e-5


def _vmem_spec():
    return pl.BlockSpec(memory_space=pltpu.MemorySpace.VMEM)


# ------------------------------ fused kernel --------------------------------

def _shift_cols(x, s):
    """out[:, c] = x[:, c + s]; vacated columns are zero-filled.

    Columns that cross a batch-segment boundary (and the zero-filled ones) are
    masked to zero by the caller, so only the in-segment shift matters.
    # TODO(synk): when the slab width is a multiple of 128 lanes, a single
    # pltpu.roll (XLU slot) is cheaper than slice+concat; at these toy widths
    # (<=128 lanes) slice+concat lowers more robustly.
    """
    if s == 0:
        return x
    rows = x.shape[0]
    if s > 0:
        pad = jnp.zeros((rows, s), x.dtype)
        return jnp.concatenate([x[:, s:], pad], axis=1)
    pad = jnp.zeros((rows, -s), x.dtype)
    return jnp.concatenate([pad, x[:, :s]], axis=1)


def _conv_bn_relu_pool(h, w_ref, g_ref, be_ref, pool_ref, *, B, L, K):
    """One conv block: f32 (Cin, B*L) slab -> f32 (Cout, B*(L//2)) slab."""
    N = B * L
    p = K // 2

    # Position of each lane column inside its batch segment (column = b*L + l).
    col = jax.lax.broadcasted_iota(jnp.int32, (1, N), 1)
    if (L & (L - 1)) == 0:                       # power-of-two fast path
        l_in_seg = jnp.bitwise_and(col, L - 1)
    else:
        l_in_seg = col % L

    # im2col via K full-slab shifts + boundary masks ("same" padding == zeros).
    taps = []
    for k in range(K):
        s = k - p                 # tap_k[ci, b*L + l] = h[ci, b*L + l + s]
        t = _shift_cols(h, s)
        if s > 0:
            t = jnp.where(l_in_seg < (L - s), t, 0.0)
        elif s < 0:
            t = jnp.where(l_in_seg >= (-s), t, 0.0)
        taps.append(t)
    slab = jnp.concatenate(taps, axis=0).astype(jnp.bfloat16)      # (K*Cin, N)

    # Conv1d as ONE bf16 MXU matmul (f32 accumulation).  The Conv1d bias is
    # omitted: it cancels exactly under training-mode BatchNorm below.
    y = jnp.dot(w_ref[...], slab, preferred_element_type=jnp.float32)   # (Cout, N)

    # BatchNorm1d (training-mode batch stats), one pass, folded to y*a + c.
    inv_n = 1.0 / N
    mu = jnp.sum(y, axis=1, keepdims=True) * inv_n
    var = jnp.sum(y * y, axis=1, keepdims=True) * inv_n - mu * mu
    a = g_ref[...] * jax.lax.rsqrt(var + BN_EPS)
    c = be_ref[...] - mu * a
    y = jnp.maximum(y * a + c, 0.0)                                 # ReLU

    # AvgPool1d(2): shared (L, L//2) 0.5-matrix applied per batch segment
    # (block-diagonal pooling: O(L^2) instead of O((B*L)^2)).
    yb = y.astype(jnp.bfloat16)
    pool = pool_ref[...]
    segs = [jnp.dot(yb[:, b * L:(b + 1) * L], pool,
                    preferred_element_type=jnp.float32)
            for b in range(B)]
    return jnp.concatenate(segs, axis=1)                            # (Cout, B*(L//2))


def _fused_kernel(*refs, B, block_cfgs):
    """refs = [x_slab, (w2, gamma, beta, pool) x nb, fcw, fcb, seg, out]."""
    nb = len(block_cfgs)
    x_ref = refs[0]
    idx = 1
    block_param_refs = []
    for _ in range(nb):
        block_param_refs.append(refs[idx:idx + 4])
        idx += 4
    fcw_ref, fcb_ref, seg_ref = refs[idx:idx + 3]
    idx += 3
    o_ref = refs[idx]

    h = x_ref[...]                                                  # (Cin0p, B*L0) f32
    for (w_r, g_r, be_r, pool_r), (K, L) in zip(block_param_refs, block_cfgs):
        h = _conv_bn_relu_pool(h, w_r, g_r, be_r, pool_r, B=B, L=L, K=K)

    # Linear(flatten, 1) + Sigmoid, fused:
    #   logit[b] = sum_{c,l} fc_w[c*L3 + l] * h[c, b*L3 + l] + fc_b
    prod = h * fcw_ref[...]                                         # (Cz, B*L3)
    colsum = jnp.sum(prod, axis=0, keepdims=True)                   # (1, B*L3)
    logits = jnp.dot(colsum, seg_ref[...],
                     preferred_element_type=jnp.float32) + fcb_ref[...]
    o_ref[...] = 1.0 / (1.0 + jnp.exp(-logits))                     # (1, B)


# ------------------------------ JAX wrapper ----------------------------------

def relation_module_forward(x, params):
    """Mirrors relation_module.forward with a single fused Pallas kernel."""
    f32, bf16 = jnp.float32, jnp.bfloat16
    B = x.shape[0]
    x3 = x.reshape(B, 2, -1).astype(f32)                 # torch: x.reshape(B, 2, -1)
    L0 = x3.shape[2]
    # lane-dense activation slab: (Cin0, B*L0), column index = b*L0 + l
    x_slab = jnp.transpose(x3, (1, 0, 2)).reshape(2, B * L0)

    # Pad the tiny input-channel dim up to a sublane multiple so im2col
    # concatenation / matmul rows stay 8-aligned (zero rows x zero weight
    # columns -> exactly no-op).
    first_cin = params["conv_blocks"][0][0].shape[1]
    first_cin_p = -(-first_cin // 8) * 8
    x_slab = jnp.pad(x_slab, ((0, first_cin_p - first_cin), (0, 0)))

    inputs = [x_slab]
    block_cfgs = []
    L = L0
    for (w, _bias, g, be) in params["conv_blocks"]:
        Cout, Cin, K = w.shape
        Cin_p = -(-Cin // 8) * 8
        if Cin_p != Cin:
            w = jnp.pad(w, ((0, 0), (0, Cin_p - Cin), (0, 0)))
        # (Cout, K*Cin_p) with column index k*Cin_p + ci (matches im2col rows)
        w2 = jnp.transpose(w, (0, 2, 1)).reshape(Cout, K * Cin_p).astype(bf16)
        pool = (0.5 * (jnp.arange(L)[:, None] // 2
                       == jnp.arange(L // 2)[None, :])).astype(bf16)    # (L, L//2)
        inputs += [w2,
                   g.reshape(Cout, 1).astype(f32),
                   be.reshape(Cout, 1).astype(f32),
                   pool]
        block_cfgs.append((K, L))
        L //= 2

    Cz = params["conv_blocks"][-1][0].shape[0]
    L3 = L
    # torch flatten order is f = c*L3 + l; tile per batch so it multiplies the slab.
    fcw_slab = jnp.tile(params["fc_w"].reshape(Cz, L3).astype(f32), (1, B))
    seg = (jnp.arange(B * L3)[:, None] // L3
           == jnp.arange(B)[None, :]).astype(f32)        # (B*L3, B) segment-sum matrix
    inputs += [fcw_slab, params["fc_b"].reshape(1, 1).astype(f32), seg]

    kernel = functools.partial(_fused_kernel, B=B, block_cfgs=tuple(block_cfgs))
    out = pl.pallas_call(
        kernel,
        out_shape=jax.ShapeDtypeStruct((1, B), f32),
        in_specs=[_vmem_spec()] * len(inputs),
        out_specs=_vmem_spec(),
        compiler_params=pltpu.CompilerParams(vmem_limit_bytes=48 * 1024 * 1024),
    )(*inputs)
    return out.T                                          # (B, 1)


# ---------------------------- pure-JAX reference ----------------------------

def reference_forward(x, params):
    B = x.shape[0]
    h = x.reshape(B, 2, -1).astype(jnp.float32)
    for (w, b, g, be) in params["conv_blocks"]:
        p = w.shape[-1] // 2
        y = jax.lax.conv_general_dilated(
            h, w, window_strides=(1,), padding=[(p, p)],
            dimension_numbers=("NCH", "OIH", "NCH")) + b[None, :, None]
        mu = y.mean(axis=(0, 2), keepdims=True)
        var = ((y - mu) ** 2).mean(axis=(0, 2), keepdims=True)
        y = (y - mu) / jnp.sqrt(var + BN_EPS) * g[None, :, None] + be[None, :, None]
        y = jnp.maximum(y, 0.0)
        Bc, C, Lr = y.shape
        h = y.reshape(Bc, C, Lr // 2, 2).mean(-1)
    flat = h.reshape(B, -1)
    return jax.nn.sigmoid(flat @ params["fc_w"].T + params["fc_b"])


# --------------------------------- main --------------------------------------

def make_params(key, in_size=128, in_dim=2, hid_dim=32, z_dim=32):
    """Deterministic synthetic init matching relation_module's parameter shapes."""
    ks = [15, 7, 7]
    chans = [(in_dim, hid_dim), (hid_dim, hid_dim), (hid_dim, z_dim)]
    keys = jax.random.split(key, 2 * len(ks) + 2)
    conv_blocks = []
    for i, (k, (ci, co)) in enumerate(zip(ks, chans)):
        w = 0.1 * jax.random.normal(keys[2 * i], (co, ci, k), jnp.float32)
        b = 0.1 * jax.random.normal(keys[2 * i + 1], (co,), jnp.float32)
        gamma = jnp.ones((co,), jnp.float32)   # BatchNorm1d default init
        beta = jnp.zeros((co,), jnp.float32)
        conv_blocks.append((w, b, gamma, beta))
    flatten_size = int(0.5 * z_dim * in_size / 2 ** len(ks))
    fc_w = 0.05 * jax.random.normal(keys[-2], (1, flatten_size), jnp.float32)
    fc_b = 0.05 * jax.random.normal(keys[-1], (1,), jnp.float32)
    return {"conv_blocks": conv_blocks, "fc_w": fc_w, "fc_b": fc_b}


if __name__ == "__main__":
    key = jax.random.PRNGKey(0)
    k_x, k_p = jax.random.split(key)

    in_size = 128          # small stand-in for the default 1024
    batch = 2
    x = jax.random.normal(k_x, (batch, in_size), jnp.float32)
    params = make_params(k_p, in_size=in_size)

    fwd = jax.jit(relation_module_forward)
    out = jax.block_until_ready(fwd(x, params))
    ref = jax.block_until_ready(reference_forward(x, params))

    assert out.shape == (batch, 1)
    # bf16 MXU operands (f32 accumulation) -> looser tolerance than pure f32.
    assert jnp.allclose(out, ref, rtol=5e-2, atol=2e-2), (out, ref)

    print("KERNEL_OK")
</pallas_src>

<mosaic_0001>
module attributes {stable_mosaic.version = 11 : i64} {
  func.func @_fused_kernel(%arg0: memref<8x128xf32, #tpu.memory_space<vmem>>, %arg1: memref<32x120xbf16, #tpu.memory_space<vmem>>, %arg2: memref<32x1xf32, #tpu.memory_space<vmem>>, %arg3: memref<32x1xf32, #tpu.memory_space<vmem>>, %arg4: memref<64x32xbf16, #tpu.memory_space<vmem>>, %arg5: memref<32x224xbf16, #tpu.memory_space<vmem>>, %arg6: memref<32x1xf32, #tpu.memory_space<vmem>>, %arg7: memref<32x1xf32, #tpu.memory_space<vmem>>, %arg8: memref<32x16xbf16, #tpu.memory_space<vmem>>, %arg9: memref<32x224xbf16, #tpu.memory_space<vmem>>, %arg10: memref<32x1xf32, #tpu.memory_space<vmem>>, %arg11: memref<32x1xf32, #tpu.memory_space<vmem>>, %arg12: memref<16x8xbf16, #tpu.memory_space<vmem>>, %arg13: memref<32x16xf32, #tpu.memory_space<vmem>>, %arg14: memref<1x1xf32, #tpu.memory_space<vmem>>, %arg15: memref<16x2xf32, #tpu.memory_space<vmem>>, %arg16: memref<1x2xf32, #tpu.memory_space<vmem>>) attributes {dimension_semantics = [], scalar_prefetch = 0 : i64, scratch_operands = 0 : i64, tpu.core_type = #tpu.core_type<tc>} {
    %c0 = arith.constant 0 : index
    %c0_0 = arith.constant 0 : index
    %0 = vector.load %arg0[%c0, %c0_0] : memref<8x128xf32, #tpu.memory_space<vmem>>, vector<8x128xf32>
    %1 = tpu.iota {dimensions = array<i32: 1>} : vector<1x128xi32>
    %c63_i32 = arith.constant 63 : i32
    %2 = vector.broadcast %c63_i32 : i32 to vector<1x128xi32>
    %3 = arith.andi %1, %2 : vector<1x128xi32>
    %cst = arith.constant 0.000000e+00 : f32
    %4 = vector.broadcast %cst : f32 to vector<8x7xf32>
    %5 = vector.extract_strided_slice %0 {offsets = [0, 0], sizes = [8, 121], strides = [1, 1]} : vector<8x128xf32> to vector<8x121xf32>
    %6 = tpu.concatenate %4, %5 in 1 : vector<8x7xf32>, vector<8x121xf32> -> vector<8x128xf32>
    %c7_i32 = arith.constant 7 : i32
    %7 = vector.broadcast %c7_i32 : i32 to vector<1x128xi32>
    %8 = arith.cmpi sge, %3, %7 : vector<1x128xi32>
    %cst_1 = arith.constant 0.000000e+00 : f32
    %9 = vector.shape_cast %8 : vector<1x128xi1> to vector<1x128xi1>
    %10 = vector.broadcast %9 : vector<1x128xi1> to vector<8x128xi1>
    %11 = vector.broadcast %cst_1 : f32 to vector<8x128xf32>
    %12 = arith.select %10, %6, %11 : vector<8x128xi1>, vector<8x128xf32>
    %cst_2 = arith.constant 0.000000e+00 : f32
    %13 = vector.broadcast %cst_2 : f32 to vector<8x6xf32>
    %14 = vector.extract_strided_slice %0 {offsets = [0, 0], sizes = [8, 122], strides = [1, 1]} : vector<8x128xf32> to vector<8x122xf32>
    %15 = tpu.concatenate %13, %14 in 1 : vector<8x6xf32>, vector<8x122xf32> -> vector<8x128xf32>
    %c6_i32 = arith.constant 6 : i32
    %16 = vector.broadcast %c6_i32 : i32 to vector<1x128xi32>
    %17 = arith.cmpi sge, %3, %16 : vector<1x128xi32>
    %cst_3 = arith.constant 0.000000e+00 : f32
    %18 = vector.shape_cast %17 : vector<1x128xi1> to vector<1x128xi1>
    %19 = vector.broadcast %18 : vector<1x128xi1> to vector<8x128xi1>
    %20 = vector.broadcast %cst_3 : f32 to vector<8x128xf32>
    %21 = arith.select %19, %15, %20 : vector<8x128xi1>, vector<8x128xf32>
    %cst_4 = arith.constant 0.000000e+00 : f32
    %22 = vector.broadcast %cst_4 : f32 to vector<8x5xf32>
    %23 = vector.extract_strided_slice %0 {offsets = [0, 0], sizes = [8, 123], strides = [1, 1]} : vector<8x128xf32> to vector<8x123xf32>
    %24 = tpu.concatenate %22, %23 in 1 : vector<8x5xf32>, vector<8x123xf32> -> vector<8x128xf32>
    %c5_i32 = arith.constant 5 : i32
    %25 = vector.broadcast %c5_i32 : i32 to vector<1x128xi32>
    %26 = arith.cmpi sge, %3, %25 : vector<1x128xi32>
    %cst_5 = arith.constant 0.000000e+00 : f32
    %27 = vector.shape_cast %26 : vector<1x128xi1> to vector<1x128xi1>
    %28 = vector.broadcast %27 : vector<1x128xi1> to vector<8x128xi1>
    %29 = vector.broadcast %cst_5 : f32 to vector<8x128xf32>
    %30 = arith.select %28, %24, %29 : vector<8x128xi1>, vector<8x128xf32>
    %cst_6 = arith.constant 0.000000e+00 : f32
    %31 = vector.broadcast %cst_6 : f32 to vector<8x4xf32>
    %32 = vector.extract_strided_slice %0 {offsets = [0, 0], sizes = [8, 124], strides = [1, 1]} : vector<8x128xf32> to vector<8x124xf32>
    %33 = tpu.concatenate %31, %32 in 1 : vector<8x4xf32>, vector<8x124xf32> -> vector<8x128xf32>
    %c4_i32 = arith.constant 4 : i32
    %34 = vector.broadcast %c4_i32 : i32 to vector<1x128xi32>
    %35 = arith.cmpi sge, %3, %34 : vector<1x128xi32>
    %cst_7 = arith.constant 0.000000e+00 : f32
    %36 = vector.shape_cast %35 : vector<1x128xi1> to vector<1x128xi1>
    %37 = vector.broadcast %36 : vector<1x128xi1> to vector<8x128xi1>
    %38 = vector.broadcast %cst_7 : f32 to vector<8x128xf32>
    %39 = arith.select %37, %33, %38 : vector<8x128xi1>, vector<8x128xf32>
    %cst_8 = arith.constant 0.000000e+00 : f32
    %40 = vector.broadcast %cst_8 : f32 to vector<8x3xf32>
    %41 = vector.extract_strided_slice %0 {offsets = [0, 0], sizes = [8, 125], strides = [1, 1]} : vector<8x128xf32> to vector<8x125xf32>
    %42 = tpu.concatenate %40, %41 in 1 : vector<8x3xf32>, vector<8x125xf32> -> vector<8x128xf32>
    %c3_i32 = arith.constant 3 : i32
    %43 = vector.broadcast %c3_i32 : i32 to vector<1x128xi32>
    %44 = arith.cmpi sge, %3, %43 : vector<1x128xi32>
    %cst_9 = arith.constant 0.000000e+00 : f32
    %45 = vector.shape_cast %44 : vector<1x128xi1> to vector<1x128xi1>
    %46 = vector.broadcast %45 : vector<1x128xi1> to vector<8x128xi1>
    %47 = vector.broadcast %cst_9 : f32 to vector<8x128xf32>
    %48 = arith.select %46, %42, %47 : vector<8x128xi1>, vector<8x128xf32>
    %cst_10 = arith.constant 0.000000e+00 : f32
    %49 = vector.broadcast %cst_10 : f32 to vector<8x2xf32>
    %50 = vector.extract_strided_slice %0 {offsets = [0, 0], sizes = [8, 126], strides = [1, 1]} : vector<8x128xf32> to vector<8x126xf32>
    %51 = tpu.concatenate %49, %50 in 1 : vector<8x2xf32>, vector<8x126xf32> -> vector<8x128xf32>
    %c2_i32 = arith.constant 2 : i32
    %52 = vector.broadcast %c2_i32 : i32 to vector<1x128xi32>
    %53 = arith.cmpi sge, %3, %52 : vector<1x128xi32>
    %cst_11 = arith.constant 0.000000e+00 : f32
    %54 = vector.shape_cast %53 : vector<1x128xi1> to vector<1x128xi1>
    %55 = vector.broadcast %54 : vector<1x128xi1> to vector<8x128xi1>
    %56 = vector.broadcast %cst_11 : f32 to vector<8x128xf32>
    %57 = arith.select %55, %51, %56 : vector<8x128xi1>, vector<8x128xf32>
    %cst_12 = arith.constant 0.000000e+00 : f32
    %58 = vector.broadcast %cst_12 : f32 to vector<8x1xf32>
    %59 = vector.extract_strided_slice %0 {offsets = [0, 0], sizes = [8, 127], strides = [1, 1]} : vector<8x128xf32> to vector<8x127xf32>
    %60 = tpu.concatenate %58, %59 in 1 : vector<8x1xf32>, vector<8x127xf32> -> vector<8x128xf32>
    %c1_i32 = arith.constant 1 : i32
    %61 = vector.broadcast %c1_i32 : i32 to vector<1x128xi32>
    %62 = arith.cmpi sge, %3, %61 : vector<1x128xi32>
    %cst_13 = arith.constant 0.000000e+00 : f32
    %63 = vector.shape_cast %62 : vector<1x128xi1> to vector<1x128xi1>
    %64 = vector.broadcast %63 : vector<1x128xi1> to vector<8x128xi1>
    %65 = vector.broadcast %cst_13 : f32 to vector<8x128xf32>
    %66 = arith.select %64, %60, %65 : vector<8x128xi1>, vector<8x128xf32>
    %cst_14 = arith.constant 0.000000e+00 : f32
    %67 = vector.broadcast %cst_14 : f32 to vector<8x1xf32>
    %68 = vector.extract_strided_slice %0 {offsets = [0, 1], sizes = [8, 127], strides = [1, 1]} : vector<8x128xf32> to vector<8x127xf32>
    %69 = tpu.concatenate %68, %67 in 1 : vector<8x127xf32>, vector<8x1xf32> -> vector<8x128xf32>
    %c63_i32_15 = arith.constant 63 : i32
    %70 = vector.broadcast %c63_i32_15 : i32 to vector<1x128xi32>
    %71 = arith.cmpi slt, %3, %70 : vector<1x128xi32>
    %cst_16 = arith.constant 0.000000e+00 : f32
    %72 = vector.shape_cast %71 : vector<1x128xi1> to vector<1x128xi1>
    %73 = vector.broadcast %72 : vector<1x128xi1> to vector<8x128xi1>
    %74 = vector.broadcast %cst_16 : f32 to vector<8x128xf32>
    %75 = arith.select %73, %69, %74 : vector<8x128xi1>, vector<8x128xf32>
    %cst_17 = arith.constant 0.000000e+00 : f32
    %76 = vector.broadcast %cst_17 : f32 to vector<8x2xf32>
    %77 = vector.extract_strided_slice %0 {offsets = [0, 2], sizes = [8, 126], strides = [1, 1]} : vector<8x128xf32> to vector<8x126xf32>
    %78 = tpu.concatenate %77, %76 in 1 : vector<8x126xf32>, vector<8x2xf32> -> vector<8x128xf32>
    %c62_i32 = arith.constant 62 : i32
    %79 = vector.broadcast %c62_i32 : i32 to vector<1x128xi32>
    %80 = arith.cmpi slt, %3, %79 : vector<1x128xi32>
    %cst_18 = arith.constant 0.000000e+00 : f32
    %81 = vector.shape_cast %80 : vector<1x128xi1> to vector<1x128xi1>
    %82 = vector.broadcast %81 : vector<1x128xi1> to vector<8x128xi1>
    %83 = vector.broadcast %cst_18 : f32 to vector<8x128xf32>
    %84 = arith.select %82, %78, %83 : vector<8x128xi1>, vector<8x128xf32>
    %cst_19 = arith.constant 0.000000e+00 : f32
    %85 = vector.broadcast %cst_19 : f32 to vector<8x3xf32>
    %86 = vector.extract_strided_slice %0 {offsets = [0, 3], sizes = [8, 125], strides = [1, 1]} : vector<8x128xf32> to vector<8x125xf32>
    %87 = tpu.concatenate %86, %85 in 1 : vector<8x125xf32>, vector<8x3xf32> -> vector<8x128xf32>
    %c61_i32 = arith.constant 61 : i32
    %88 = vector.broadcast %c61_i32 : i32 to vector<1x128xi32>
    %89 = arith.cmpi slt, %3, %88 : vector<1x128xi32>
    %cst_20 = arith.constant 0.000000e+00 : f32
    %90 = vector.shape_cast %89 : vector<1x128xi1> to vector<1x128xi1>
    %91 = vector.broadcast %90 : vector<1x128xi1> to vector<8x128xi1>
    %92 = vector.broadcast %cst_20 : f32 to vector<8x128xf32>
    %93 = arith.select %91, %87, %92 : vector<8x128xi1>, vector<8x128xf32>
    %cst_21 = arith.constant 0.000000e+00 : f32
    %94 = vector.broadcast %cst_21 : f32 to vector<8x4xf32>
    %95 = vector.extract_strided_slice %0 {offsets = [0, 4], sizes = [8, 124], strides = [1, 1]} : vector<8x128xf32> to vector<8x124xf32>
    %96 = tpu.concatenate %95, %94 in 1 : vector<8x124xf32>, vector<8x4xf32> -> vector<8x128xf32>
    %c60_i32 = arith.constant 60 : i32
    %97 = vector.broadcast %c60_i32 : i32 to vector<1x128xi32>
    %98 = arith.cmpi slt, %3, %97 : vector<1x128xi32>
    %cst_22 = arith.constant 0.000000e+00 : f32
    %99 = vector.shape_cast %98 : vector<1x128xi1> to vector<1x128xi1>
    %100 = vector.broadcast %99 : vector<1x128xi1> to vector<8x128xi1>
    %101 = vector.broadcast %cst_22 : f32 to vector<8x128xf32>
    %102 = arith.select %100, %96, %101 : vector<8x128xi1>, vector<8x128xf32>
    %cst_23 = arith.constant 0.000000e+00 : f32
    %103 = vector.broadcast %cst_23 : f32 to vector<8x5xf32>
    %104 = vector.extract_strided_slice %0 {offsets = [0, 5], sizes = [8, 123], strides = [1, 1]} : vector<8x128xf32> to vector<8x123xf32>
    %105 = tpu.concatenate %104, %103 in 1 : vector<8x123xf32>, vector<8x5xf32> -> vector<8x128xf32>
    %c59_i32 = arith.constant 59 : i32
    %106 = vector.broadcast %c59_i32 : i32 to vector<1x128xi32>
    %107 = arith.cmpi slt, %3, %106 : vector<1x128xi32>
    %cst_24 = arith.constant 0.000000e+00 : f32
    %108 = vector.shape_cast %107 : vector<1x128xi1> to vector<1x128xi1>
    %109 = vector.broadcast %108 : vector<1x128xi1> to vector<8x128xi1>
    %110 = vector.broadcast %cst_24 : f32 to vector<8x128xf32>
    %111 = arith.select %109, %105, %110 : vector<8x128xi1>, vector<8x128xf32>
    %cst_25 = arith.constant 0.000000e+00 : f32
    %112 = vector.broadcast %cst_25 : f32 to vector<8x6xf32>
    %113 = vector.extract_strided_slice %0 {offsets = [0, 6], sizes = [8, 122], strides = [1, 1]} : vector<8x128xf32> to vector<8x122xf32>
    %114 = tpu.concatenate %113, %112 in 1 : vector<8x122xf32>, vector<8x6xf32> -> vector<8x128xf32>
    %c58_i32 = arith.constant 58 : i32
    %115 = vector.broadcast %c58_i32 : i32 to vector<1x128xi32>
    %116 = arith.cmpi slt, %3, %115 : vector<1x128xi32>
    %cst_26 = arith.constant 0.000000e+00 : f32
    %117 = vector.shape_cast %116 : vector<1x128xi1> to vector<1x128xi1>
    %118 = vector.broadcast %117 : vector<1x128xi1> to vector<8x128xi1>
    %119 = vector.broadcast %cst_26 : f32 to vector<8x128xf32>
    %120 = arith.select %118, %114, %119 : vector<8x128xi1>, vector<8x128xf32>
    %cst_27 = arith.constant 0.000000e+00 : f32
    %121 = vector.broadcast %cst_27 : f32 to vector<8x7xf32>
    %122 = vector.extract_strided_slice %0 {offsets = [0, 7], sizes = [8, 121], strides = [1, 1]} : vector<8x128xf32> to vector<8x121xf32>
    %123 = tpu.concatenate %122, %121 in 1 : vector<8x121xf32>, vector<8x7xf32> -> vector<8x128xf32>
    %c57_i32 = arith.constant 57 : i32
    %124 = vector.broadcast %c57_i32 : i32 to vector<1x128xi32>
    %125 = arith.cmpi slt, %3, %124 : vector<1x128xi32>
    %cst_28 = arith.constant 0.000000e+00 : f32
    %126 = vector.shape_cast %125 : vector<1x128xi1> to vector<1x128xi1>
    %127 = vector.broadcast %126 : vector<1x128xi1> to vector<8x128xi1>
    %128 = vector.broadcast %cst_28 : f32 to vector<8x128xf32>
    %129 = arith.select %127, %123, %128 : vector<8x128xi1>, vector<8x128xf32>
    %130 = tpu.concatenate %12, %21, %30, %39, %48, %57, %66, %0, %75, %84, %93, %102, %111, %120, %129 in 0 : vector<8x128xf32>, vector<8x128xf32>, vector<8x128xf32>, vector<8x128xf32>, vector<8x128xf32>, vector<8x128xf32>, vector<8x128xf32>, vector<8x128xf32>, vector<8x128xf32>, vector<8x128xf32>, vector<8x128xf32>, vector<8x128xf32>, vector<8x128xf32>, vector<8x128xf32>, vector<8x128xf32> -> vector<120x128xf32>
    %131 = arith.truncf %130 : vector<120x128xf32> to vector<120x128xbf16>
    %c0_29 = arith.constant 0 : index
    %c0_30 = arith.constant 0 : index
    %132 = vector.load %arg1[%c0_29, %c0_30] : memref<32x120xbf16, #tpu.memory_space<vmem>>, vector<32x120xbf16>
    %cst_31 = arith.constant dense<0.000000e+00> : vector<32x128xf32>
    %133 = tpu.matmul %132, %131, %cst_31 {dimension_numbers = #tpu.dot_dimension_numbers<[1], [0], [0], [1], [0, 0, 1, 1], [], []>} : vector<32x120xbf16>, vector<120x128xbf16>, vector<32x128xf32> -> vector<32x128xf32>
    %cst_32 = arith.constant dense<0.000000e+00> : vector<32xf32>
    %134 = vector.multi_reduction <add>, %133, %cst_32 [1] : vector<32x128xf32> to vector<32xf32>
    %135 = vector.shape_cast %134 : vector<32xf32> to vector<32x1xf32>
    %cst_33 = arith.constant 7.812500e-03 : f32
    %136 = vector.broadcast %cst_33 : f32 to vector<32x1xf32>
    %137 = arith.mulf %135, %136 : vector<32x1xf32>
    %138 = arith.mulf %133, %133 : vector<32x128xf32>
    %cst_34 = arith.constant dense<0.000000e+00> : vector<32xf32>
    %139 = vector.multi_reduction <add>, %138, %cst_34 [1] : vector<32x128xf32> to vector<32xf32>
    %140 = vector.shape_cast %139 : vector<32xf32> to vector<32x1xf32>
    %cst_35 = arith.constant 7.812500e-03 : f32
    %141 = vector.broadcast %cst_35 : f32 to vector<32x1xf32>
    %142 = arith.mulf %140, %141 : vector<32x1xf32>
    %143 = arith.mulf %137, %137 : vector<32x1xf32>
    %144 = arith.subf %142, %143 : vector<32x1xf32>
    %c0_36 = arith.constant 0 : index
    %c0_37 = arith.constant 0 : index
    %145 = vector.load %arg2[%c0_36, %c0_37] : memref<32x1xf32, #tpu.memory_space<vmem>>, vector<32x1xf32>
    %cst_38 = arith.constant 9.99999974E-6 : f32
    %146 = vector.broadcast %cst_38 : f32 to vector<32x1xf32>
    %147 = arith.addf %144, %146 : vector<32x1xf32>
    %148 = math.rsqrt %147 : vector<32x1xf32>
    %149 = arith.mulf %145, %148 : vector<32x1xf32>
    %c0_39 = arith.constant 0 : index
    %c0_40 = arith.constant 0 : index
    %150 = vector.load %arg3[%c0_39, %c0_40] : memref<32x1xf32, #tpu.memory_space<vmem>>, vector<32x1xf32>
    %151 = arith.mulf %137, %149 : vector<32x1xf32>
    %152 = arith.subf %150, %151 : vector<32x1xf32>
    %153 = vector.broadcast %149 : vector<32x1xf32> to vector<32x128xf32>
    %154 = arith.mulf %133, %153 : vector<32x128xf32>
    %155 = vector.broadcast %152 : vector<32x1xf32> to vector<32x128xf32>
    %156 = arith.addf %154, %155 : vector<32x128xf32>
    %cst_41 = arith.constant 0.000000e+00 : f32
    %157 = vector.broadcast %cst_41 : f32 to vector<32x128xf32>
    %158 = arith.maximumf %156, %157 : vector<32x128xf32>
    %159 = arith.truncf %158 : vector<32x128xf32> to vector<32x128xbf16>
    %c0_42 = arith.constant 0 : index
    %c0_43 = arith.constant 0 : index
    %160 = vector.load %arg4[%c0_42, %c0_43] : memref<64x32xbf16, #tpu.memory_space<vmem>>, vector<64x32xbf16>
    %161 = vector.extract_strided_slice %159 {offsets = [0, 0], sizes = [32, 64], strides = [1, 1]} : vector<32x128xbf16> to vector<32x64xbf16>
    %cst_44 = arith.constant dense<0.000000e+00> : vector<32x32xf32>
    %162 = tpu.matmul %161, %160, %cst_44 {dimension_numbers = #tpu.dot_dimension_numbers<[1], [0], [0], [1], [0, 0, 1, 1], [], []>} : vector<32x64xbf16>, vector<64x32xbf16>, vector<32x32xf32> -> vector<32x32xf32>
    %163 = vector.extract_strided_slice %159 {offsets = [0, 64], sizes = [32, 64], strides = [1, 1]} : vector<32x128xbf16> to vector<32x64xbf16>
    %cst_45 = arith.constant dense<0.000000e+00> : vector<32x32xf32>
    %164 = tpu.matmul %163, %160, %cst_45 {dimension_numbers = #tpu.dot_dimension_numbers<[1], [0], [0], [1], [0, 0, 1, 1], [], []>} : vector<32x64xbf16>, vector<64x32xbf16>, vector<32x32xf32> -> vector<32x32xf32>
    %165 = tpu.concatenate %162, %164 in 1 : vector<32x32xf32>, vector<32x32xf32> -> vector<32x64xf32>
    %166 = tpu.iota {dimensions = array<i32: 1>} : vector<1x64xi32>
    %c31_i32 = arith.constant 31 : i32
    %167 = vector.broadcast %c31_i32 : i32 to vector<1x64xi32>
    %168 = arith.andi %166, %167 : vector<1x64xi32>
    %cst_46 = arith.constant 0.000000e+00 : f32
    %169 = vector.broadcast %cst_46 : f32 to vector<32x3xf32>
    %170 = vector.extract_strided_slice %165 {offsets = [0, 0], sizes = [32, 61], strides = [1, 1]} : vector<32x64xf32> to vector<32x61xf32>
    %171 = tpu.concatenate %169, %170 in 1 : vector<32x3xf32>, vector<32x61xf32> -> vector<32x64xf32>
    %c3_i32_47 = arith.constant 3 : i32
    %172 = vector.broadcast %c3_i32_47 : i32 to vector<1x64xi32>
    %173 = arith.cmpi sge, %168, %172 : vector<1x64xi32>
    %cst_48 = arith.constant 0.000000e+00 : f32
    %174 = vector.shape_cast %173 : vector<1x64xi1> to vector<1x64xi1>
    %175 = vector.broadcast %174 : vector<1x64xi1> to vector<32x64xi1>
    %176 = vector.broadcast %cst_48 : f32 to vector<32x64xf32>
    %177 = arith.select %175, %171, %176 : vector<32x64xi1>, vector<32x64xf32>
    %cst_49 = arith.constant 0.000000e+00 : f32
    %178 = vector.broadcast %cst_49 : f32 to vector<32x2xf32>
    %179 = vector.extract_strided_slice %165 {offsets = [0, 0], sizes = [32, 62], strides = [1, 1]} : vector<32x64xf32> to vector<32x62xf32>
    %180 = tpu.concatenate %178, %179 in 1 : vector<32x2xf32>, vector<32x62xf32> -> vector<32x64xf32>
    %c2_i32_50 = arith.constant 2 : i32
    %181 = vector.broadcast %c2_i32_50 : i32 to vector<1x64xi32>
    %182 = arith.cmpi sge, %168, %181 : vector<1x64xi32>
    %cst_51 = arith.constant 0.000000e+00 : f32
    %183 = vector.shape_cast %182 : vector<1x64xi1> to vector<1x64xi1>
    %184 = vector.broadcast %183 : vector<1x64xi1> to vector<32x64xi1>
    %185 = vector.broadcast %cst_51 : f32 to vector<32x64xf32>
    %186 = arith.select %184, %180, %185 : vector<32x64xi1>, vector<32x64xf32>
    %cst_52 = arith.constant 0.000000e+00 : f32
    %187 = vector.broadcast %cst_52 : f32 to vector<32x1xf32>
    %188 = vector.extract_strided_slice %165 {offsets = [0, 0], sizes = [32, 63], strides = [1, 1]} : vector<32x64xf32> to vector<32x63xf32>
    %189 = tpu.concatenate %187, %188 in 1 : vector<32x1xf32>, vector<32x63xf32> -> vector<32x64xf32>
    %c1_i32_53 = arith.constant 1 : i32
    %190 = vector.broadcast %c1_i32_53 : i32 to vector<1x64xi32>
    %191 = arith.cmpi sge, %168, %190 : vector<1x64xi32>
    %cst_54 = arith.constant 0.000000e+00 : f32
    %192 = vector.shape_cast %191 : vector<1x64xi1> to vector<1x64xi1>
    %193 = vector.broadcast %192 : vector<1x64xi1> to vector<32x64xi1>
    %194 = vector.broadcast %cst_54 : f32 to vector<32x64xf32>
    %195 = arith.select %193, %189, %194 : vector<32x64xi1>, vector<32x64xf32>
    %cst_55 = arith.constant 0.000000e+00 : f32
    %196 = vector.broadcast %cst_55 : f32 to vector<32x1xf32>
    %197 = vector.extract_strided_slice %165 {offsets = [0, 1], sizes = [32, 63], strides = [1, 1]} : vector<32x64xf32> to vector<32x63xf32>
    %198 = tpu.concatenate %197, %196 in 1 : vector<32x63xf32>, vector<32x1xf32> -> vector<32x64xf32>
    %c31_i32_56 = arith.constant 31 : i32
    %199 = vector.broadcast %c31_i32_56 : i32 to vector<1x64xi32>
    %200 = arith.cmpi slt, %168, %199 : vector<1x64xi32>
    %cst_57 = arith.constant 0.000000e+00 : f32
    %201 = vector.shape_cast %200 : vector<1x64xi1> to vector<1x64xi1>
    %202 = vector.broadcast %201 : vector<1x64xi1> to vector<32x64xi1>
    %203 = vector.broadcast %cst_57 : f32 to vector<32x64xf32>
    %204 = arith.select %202, %198, %203 : vector<32x64xi1>, vector<32x64xf32>
    %cst_58 = arith.constant 0.000000e+00 : f32
    %205 = vector.broadcast %cst_58 : f32 to vector<32x2xf32>
    %206 = vector.extract_strided_slice %165 {offsets = [0, 2], sizes = [32, 62], strides = [1, 1]} : vector<32x64xf32> to vector<32x62xf32>
    %207 = tpu.concatenate %206, %205 in 1 : vector<32x62xf32>, vector<32x2xf32> -> vector<32x64xf32>
    %c30_i32 = arith.constant 30 : i32
    %208 = vector.broadcast %c30_i32 : i32 to vector<1x64xi32>
    %209 = arith.cmpi slt, %168, %208 : vector<1x64xi32>
    %cst_59 = arith.constant 0.000000e+00 : f32
    %210 = vector.shape_cast %209 : vector<1x64xi1> to vector<1x64xi1>
    %211 = vector.broadcast %210 : vector<1x64xi1> to vector<32x64xi1>
    %212 = vector.broadcast %cst_59 : f32 to vector<32x64xf32>
    %213 = arith.select %211, %207, %212 : vector<32x64xi1>, vector<32x64xf32>
    %cst_60 = arith.constant 0.000000e+00 : f32
    %214 = vector.broadcast %cst_60 : f32 to vector<32x3xf32>
    %215 = vector.extract_strided_slice %165 {offsets = [0, 3], sizes = [32, 61], strides = [1, 1]} : vector<32x64xf32> to vector<32x61xf32>
    %216 = tpu.concatenate %215, %214 in 1 : vector<32x61xf32>, vector<32x3xf32> -> vector<32x64xf32>
    %c29_i32 = arith.constant 29 : i32
    %217 = vector.broadcast %c29_i32 : i32 to vector<1x64xi32>
    %218 = arith.cmpi slt, %168, %217 : vector<1x64xi32>
    %cst_61 = arith.constant 0.000000e+00 : f32
    %219 = vector.shape_cast %218 : vector<1x64xi1> to vector<1x64xi1>
    %220 = vector.broadcast %219 : vector<1x64xi1> to vector<32x64xi1>
    %221 = vector.broadcast %cst_61 : f32 to vector<32x64xf32>
    %222 = arith.select %220, %216, %221 : vector<32x64xi1>, vector<32x64xf32>
    %223 = tpu.concatenate %177, %186, %195, %165, %204, %213, %222 in 0 : vector<32x64xf32>, vector<32x64xf32>, vector<32x64xf32>, vector<32x64xf32>, vector<32x64xf32>, vector<32x64xf32>, vector<32x64xf32> -> vector<224x64xf32>
    %224 = arith.truncf %223 : vector<224x64xf32> to vector<224x64xbf16>
    %c0_62 = arith.constant 0 : index
    %c0_63 = arith.constant 0 : index
    %225 = vector.load %arg5[%c0_62, %c0_63] : memref<32x224xbf16, #tpu.memory_space<vmem>>, vector<32x224xbf16>
    %cst_64 = arith.constant dense<0.000000e+00> : vector<32x64xf32>
    %226 = tpu.matmul %225, %224, %cst_64 {dimension_numbers = #tpu.dot_dimension_numbers<[1], [0], [0], [1], [0, 0, 1, 1], [], []>} : vector<32x224xbf16>, vector<224x64xbf16>, vector<32x64xf32> -> vector<32x64xf32>
    %cst_65 = arith.constant dense<0.000000e+00> : vector<32xf32>
    %227 = vector.multi_reduction <add>, %226, %cst_65 [1] : vector<32x64xf32> to vector<32xf32>
    %228 = vector.shape_cast %227 : vector<32xf32> to vector<32x1xf32>
    %cst_66 = arith.constant 1.562500e-02 : f32
    %229 = vector.broadcast %cst_66 : f32 to vector<32x1xf32>
    %230 = arith.mulf %228, %229 : vector<32x1xf32>
    %231 = arith.mulf %226, %226 : vector<32x64xf32>
    %cst_67 = arith.constant dense<0.000000e+00> : vector<32xf32>
    %232 = vector.multi_reduction <add>, %231, %cst_67 [1] : vector<32x64xf32> to vector<32xf32>
    %233 = vector.shape_cast %232 : vector<32xf32> to vector<32x1xf32>
    %cst_68 = arith.constant 1.562500e-02 : f32
    %234 = vector.broadcast %cst_68 : f32 to vector<32x1xf32>
    %235 = arith.mulf %233, %234 : vector<32x1xf32>
    %236 = arith.mulf %230, %230 : vector<32x1xf32>
    %237 = arith.subf %235, %236 : vector<32x1xf32>
    %c0_69 = arith.constant 0 : index
    %c0_70 = arith.constant 0 : index
    %238 = vector.load %arg6[%c0_69, %c0_70] : memref<32x1xf32, #tpu.memory_space<vmem>>, vector<32x1xf32>
    %cst_71 = arith.constant 9.99999974E-6 : f32
    %239 = vector.broadcast %cst_71 : f32 to vector<32x1xf32>
    %240 = arith.addf %237, %239 : vector<32x1xf32>
    %241 = math.rsqrt %240 : vector<32x1xf32>
    %242 = arith.mulf %238, %241 : vector<32x1xf32>
    %c0_72 = arith.constant 0 : index
    %c0_73 = arith.constant 0 : index
    %243 = vector.load %arg7[%c0_72, %c0_73] : memref<32x1xf32, #tpu.memory_space<vmem>>, vector<32x1xf32>
    %244 = arith.mulf %230, %242 : vector<32x1xf32>
    %245 = arith.subf %243, %244 : vector<32x1xf32>
    %246 = vector.broadcast %242 : vector<32x1xf32> to vector<32x64xf32>
    %247 = arith.mulf %226, %246 : vector<32x64xf32>
    %248 = vector.broadcast %245 : vector<32x1xf32> to vector<32x64xf32>
    %249 = arith.addf %247, %248 : vector<32x64xf32>
    %cst_74 = arith.constant 0.000000e+00 : f32
    %250 = vector.broadcast %cst_74 : f32 to vector<32x64xf32>
    %251 = arith.maximumf %249, %250 : vector<32x64xf32>
    %252 = arith.truncf %251 : vector<32x64xf32> to vector<32x64xbf16>
    %c0_75 = arith.constant 0 : index
    %c0_76 = arith.constant 0 : index
    %253 = vector.load %arg8[%c0_75, %c0_76] : memref<32x16xbf16, #tpu.memory_space<vmem>>, vector<32x16xbf16>
    %254 = vector.extract_strided_slice %252 {offsets = [0, 0], sizes = [32, 32], strides = [1, 1]} : vector<32x64xbf16> to vector<32x32xbf16>
    %cst_77 = arith.constant dense<0.000000e+00> : vector<32x16xf32>
    %255 = tpu.matmul %254, %253, %cst_77 {dimension_numbers = #tpu.dot_dimension_numbers<[1], [0], [0], [1], [0, 0, 1, 1], [], []>} : vector<32x32xbf16>, vector<32x16xbf16>, vector<32x16xf32> -> vector<32x16xf32>
    %256 = vector.extract_strided_slice %252 {offsets = [0, 32], sizes = [32, 32], strides = [1, 1]} : vector<32x64xbf16> to vector<32x32xbf16>
    %cst_78 = arith.constant dense<0.000000e+00> : vector<32x16xf32>
    %257 = tpu.matmul %256, %253, %cst_78 {dimension_numbers = #tpu.dot_dimension_numbers<[1], [0], [0], [1], [0, 0, 1, 1], [], []>} : vector<32x32xbf16>, vector<32x16xbf16>, vector<32x16xf32> -> vector<32x16xf32>
    %258 = tpu.concatenate %255, %257 in 1 : vector<32x16xf32>, vector<32x16xf32> -> vector<32x32xf32>
    %259 = tpu.iota {dimensions = array<i32: 1>} : vector<1x32xi32>
    %c15_i32 = arith.constant 15 : i32
    %260 = vector.broadcast %c15_i32 : i32 to vector<1x32xi32>
    %261 = arith.andi %259, %260 : vector<1x32xi32>
    %cst_79 = arith.constant 0.000000e+00 : f32
    %262 = vector.broadcast %cst_79 : f32 to vector<32x3xf32>
    %263 = vector.extract_strided_slice %258 {offsets = [0, 0], sizes = [32, 29], strides = [1, 1]} : vector<32x32xf32> to vector<32x29xf32>
    %264 = tpu.concatenate %262, %263 in 1 : vector<32x3xf32>, vector<32x29xf32> -> vector<32x32xf32>
    %c3_i32_80 = arith.constant 3 : i32
    %265 = vector.broadcast %c3_i32_80 : i32 to vector<1x32xi32>
    %266 = arith.cmpi sge, %261, %265 : vector<1x32xi32>
    %cst_81 = arith.constant 0.000000e+00 : f32
    %267 = vector.shape_cast %266 : vector<1x32xi1> to vector<1x32xi1>
    %268 = vector.broadcast %267 : vector<1x32xi1> to vector<32x32xi1>
    %269 = vector.broadcast %cst_81 : f32 to vector<32x32xf32>
    %270 = arith.select %268, %264, %269 : vector<32x32xi1>, vector<32x32xf32>
    %cst_82 = arith.constant 0.000000e+00 : f32
    %271 = vector.broadcast %cst_82 : f32 to vector<32x2xf32>
    %272 = vector.extract_strided_slice %258 {offsets = [0, 0], sizes = [32, 30], strides = [1, 1]} : vector<32x32xf32> to vector<32x30xf32>
    %273 = tpu.concatenate %271, %272 in 1 : vector<32x2xf32>, vector<32x30xf32> -> vector<32x32xf32>
    %c2_i32_83 = arith.constant 2 : i32
    %274 = vector.broadcast %c2_i32_83 : i32 to vector<1x32xi32>
    %275 = arith.cmpi sge, %261, %274 : vector<1x32xi32>
    %cst_84 = arith.constant 0.000000e+00 : f32
    %276 = vector.shape_cast %275 : vector<1x32xi1> to vector<1x32xi1>
    %277 = vector.broadcast %276 : vector<1x32xi1> to vector<32x32xi1>
    %278 = vector.broadcast %cst_84 : f32 to vector<32x32xf32>
    %279 = arith.select %277, %273, %278 : vector<32x32xi1>, vector<32x32xf32>
    %cst_85 = arith.constant 0.000000e+00 : f32
    %280 = vector.broadcast %cst_85 : f32 to vector<32x1xf32>
    %281 = vector.extract_strided_slice %258 {offsets = [0, 0], sizes = [32, 31], strides = [1, 1]} : vector<32x32xf32> to vector<32x31xf32>
    %282 = tpu.concatenate %280, %281 in 1 : vector<32x1xf32>, vector<32x31xf32> -> vector<32x32xf32>
    %c1_i32_86 = arith.constant 1 : i32
    %283 = vector.broadcast %c1_i32_86 : i32 to vector<1x32xi32>
    %284 = arith.cmpi sge, %261, %283 : vector<1x32xi32>
    %cst_87 = arith.constant 0.000000e+00 : f32
    %285 = vector.shape_cast %284 : vector<1x32xi1> to vector<1x32xi1>
    %286 = vector.broadcast %285 : vector<1x32xi1> to vector<32x32xi1>
    %287 = vector.broadcast %cst_87 : f32 to vector<32x32xf32>
    %288 = arith.select %286, %282, %287 : vector<32x32xi1>, vector<32x32xf32>
    %cst_88 = arith.constant 0.000000e+00 : f32
    %289 = vector.broadcast %cst_88 : f32 to vector<32x1xf32>
    %290 = vector.extract_strided_slice %258 {offsets = [0, 1], sizes = [32, 31], strides = [1, 1]} : vector<32x32xf32> to vector<32x31xf32>
    %291 = tpu.concatenate %290, %289 in 1 : vector<32x31xf32>, vector<32x1xf32> -> vector<32x32xf32>
    %c15_i32_89 = arith.constant 15 : i32
    %292 = vector.broadcast %c15_i32_89 : i32 to vector<1x32xi32>
    %293 = arith.cmpi slt, %261, %292 : vector<1x32xi32>
    %cst_90 = arith.constant 0.000000e+00 : f32
    %294 = vector.shape_cast %293 : vector<1x32xi1> to vector<1x32xi1>
    %295 = vector.broadcast %294 : vector<1x32xi1> to vector<32x32xi1>
    %296 = vector.broadcast %cst_90 : f32 to vector<32x32xf32>
    %297 = arith.select %295, %291, %296 : vector<32x32xi1>, vector<32x32xf32>
    %cst_91 = arith.constant 0.000000e+00 : f32
    %298 = vector.broadcast %cst_91 : f32 to vector<32x2xf32>
    %299 = vector.extract_strided_slice %258 {offsets = [0, 2], sizes = [32, 30], strides = [1, 1]} : vector<32x32xf32> to vector<32x30xf32>
    %300 = tpu.concatenate %299, %298 in 1 : vector<32x30xf32>, vector<32x2xf32> -> vector<32x32xf32>
    %c14_i32 = arith.constant 14 : i32
    %301 = vector.broadcast %c14_i32 : i32 to vector<1x32xi32>
    %302 = arith.cmpi slt, %261, %301 : vector<1x32xi32>
    %cst_92 = arith.constant 0.000000e+00 : f32
    %303 = vector.shape_cast %302 : vector<1x32xi1> to vector<1x32xi1>
    %304 = vector.broadcast %303 : vector<1x32xi1> to vector<32x32xi1>
    %305 = vector.broadcast %cst_92 : f32 to vector<32x32xf32>
    %306 = arith.select %304, %300, %305 : vector<32x32xi1>, vector<32x32xf32>
    %cst_93 = arith.constant 0.000000e+00 : f32
    %307 = vector.broadcast %cst_93 : f32 to vector<32x3xf32>
    %308 = vector.extract_strided_slice %258 {offsets = [0, 3], sizes = [32, 29], strides = [1, 1]} : vector<32x32xf32> to vector<32x29xf32>
    %309 = tpu.concatenate %308, %307 in 1 : vector<32x29xf32>, vector<32x3xf32> -> vector<32x32xf32>
    %c13_i32 = arith.constant 13 : i32
    %310 = vector.broadcast %c13_i32 : i32 to vector<1x32xi32>
    %311 = arith.cmpi slt, %261, %310 : vector<1x32xi32>
    %cst_94 = arith.constant 0.000000e+00 : f32
    %312 = vector.shape_cast %311 : vector<1x32xi1> to vector<1x32xi1>
    %313 = vector.broadcast %312 : vector<1x32xi1> to vector<32x32xi1>
    %314 = vector.broadcast %cst_94 : f32 to vector<32x32xf32>
    %315 = arith.select %313, %309, %314 : vector<32x32xi1>, vector<32x32xf32>
    %316 = tpu.concatenate %270, %279, %288, %258, %297, %306, %315 in 0 : vector<32x32xf32>, vector<32x32xf32>, vector<32x32xf32>, vector<32x32xf32>, vector<32x32xf32>, vector<32x32xf32>, vector<32x32xf32> -> vector<224x32xf32>
    %317 = arith.truncf %316 : vector<224x32xf32> to vector<224x32xbf16>
    %c0_95 = arith.constant 0 : index
    %c0_96 = arith.constant 0 : index
    %318 = vector.load %arg9[%c0_95, %c0_96] : memref<32x224xbf16, #tpu.memory_space<vmem>>, vector<32x224xbf16>
    %cst_97 = arith.constant dense<0.000000e+00> : vector<32x32xf32>
    %319 = tpu.matmul %318, %317, %cst_97 {dimension_numbers = #tpu.dot_dimension_numbers<[1], [0], [0], [1], [0, 0, 1, 1], [], []>} : vector<32x224xbf16>, vector<224x32xbf16>, vector<32x32xf32> -> vector<32x32xf32>
    %cst_98 = arith.constant dense<0.000000e+00> : vector<32xf32>
    %320 = vector.multi_reduction <add>, %319, %cst_98 [1] : vector<32x32xf32> to vector<32xf32>
    %321 = vector.shape_cast %320 : vector<32xf32> to vector<32x1xf32>
    %cst_99 = arith.constant 3.125000e-02 : f32
    %322 = vector.broadcast %cst_99 : f32 to vector<32x1xf32>
    %323 = arith.mulf %321, %322 : vector<32x1xf32>
    %324 = arith.mulf %319, %319 : vector<32x32xf32>
    %cst_100 = arith.constant dense<0.000000e+00> : vector<32xf32>
    %325 = vector.multi_reduction <add>, %324, %cst_100 [1] : vector<32x32xf32> to vector<32xf32>
    %326 = vector.shape_cast %325 : vector<32xf32> to vector<32x1xf32>
    %cst_101 = arith.constant 3.125000e-02 : f32
    %327 = vector.broadcast %cst_101 : f32 to vector<32x1xf32>
    %328 = arith.mulf %326, %327 : vector<32x1xf32>
    %329 = arith.mulf %323, %323 : vector<32x1xf32>
    %330 = arith.subf %328, %329 : vector<32x1xf32>
    %c0_102 = arith.constant 0 : index
    %c0_103 = arith.constant 0 : index
    %331 = vector.load %arg10[%c0_102, %c0_103] : memref<32x1xf32, #tpu.memory_space<vmem>>, vector<32x1xf32>
    %cst_104 = arith.constant 9.99999974E-6 : f32
    %332 = vector.broadcast %cst_104 : f32 to vector<32x1xf32>
    %333 = arith.addf %330, %332 : vector<32x1xf32>
    %334 = math.rsqrt %333 : vector<32x1xf32>
    %335 = arith.mulf %331, %334 : vector<32x1xf32>
    %c0_105 = arith.constant 0 : index
    %c0_106 = arith.constant 0 : index
    %336 = vector.load %arg11[%c0_105, %c0_106] : memref<32x1xf32, #tpu.memory_space<vmem>>, vector<32x1xf32>
    %337 = arith.mulf %323, %335 : vector<32x1xf32>
    %338 = arith.subf %336, %337 : vector<32x1xf32>
    %339 = vector.broadcast %335 : vector<32x1xf32> to vector<32x32xf32>
    %340 = arith.mulf %319, %339 : vector<32x32xf32>
    %341 = vector.broadcast %338 : vector<32x1xf32> to vector<32x32xf32>
    %342 = arith.addf %340, %341 : vector<32x32xf32>
    %cst_107 = arith.constant 0.000000e+00 : f32
    %343 = vector.broadcast %cst_107 : f32 to vector<32x32xf32>
    %344 = arith.maximumf %342, %343 : vector<32x32xf32>
    %345 = arith.truncf %344 : vector<32x32xf32> to vector<32x32xbf16>
    %c0_108 = arith.constant 0 : index
    %c0_109 = arith.constant 0 : index
    %346 = vector.load %arg12[%c0_108, %c0_109] : memref<16x8xbf16, #tpu.memory_space<vmem>>, vector<16x8xbf16>
    %347 = vector.extract_strided_slice %345 {offsets = [0, 0], sizes = [32, 16], strides = [1, 1]} : vector<32x32xbf16> to vector<32x16xbf16>
    %cst_110 = arith.constant dense<0.000000e+00> : vector<32x8xf32>
    %348 = tpu.matmul %347, %346, %cst_110 {dimension_numbers = #tpu.dot_dimension_numbers<[1], [0], [0], [1], [0, 0, 1, 1], [], []>} : vector<32x16xbf16>, vector<16x8xbf16>, vector<32x8xf32> -> vector<32x8xf32>
    %349 = vector.extract_strided_slice %345 {offsets = [0, 16], sizes = [32, 16], strides = [1, 1]} : vector<32x32xbf16> to vector<32x16xbf16>
    %cst_111 = arith.constant dense<0.000000e+00> : vector<32x8xf32>
    %350 = tpu.matmul %349, %346, %cst_111 {dimension_numbers = #tpu.dot_dimension_numbers<[1], [0], [0], [1], [0, 0, 1, 1], [], []>} : vector<32x16xbf16>, vector<16x8xbf16>, vector<32x8xf32> -> vector<32x8xf32>
    %351 = tpu.concatenate %348, %350 in 1 : vector<32x8xf32>, vector<32x8xf32> -> vector<32x16xf32>
    %c0_112 = arith.constant 0 : index
    %c0_113 = arith.constant 0 : index
    %352 = vector.load %arg13[%c0_112, %c0_113] : memref<32x16xf32, #tpu.memory_space<vmem>>, vector<32x16xf32>
    %353 = arith.mulf %351, %352 : vector<32x16xf32>
    %cst_114 = arith.constant dense<0.000000e+00> : vector<16xf32>
    %354 = vector.multi_reduction <add>, %353, %cst_114 [0] : vector<32x16xf32> to vector<16xf32>
    %355 = vector.shape_cast %354 : vector<16xf32> to vector<1x16xf32>
    %c0_115 = arith.constant 0 : index
    %c0_116 = arith.constant 0 : index
    %356 = vector.load %arg15[%c0_115, %c0_116] : memref<16x2xf32, #tpu.memory_space<vmem>>, vector<16x2xf32>
    %cst_117 = arith.constant dense<0.000000e+00> : vector<1x2xf32>
    %357 = tpu.matmul %355, %356, %cst_117 {dimension_numbers = #tpu.dot_dimension_numbers<[1], [0], [0], [1], [0, 0, 1, 1], [], []>} : vector<1x16xf32>, vector<16x2xf32>, vector<1x2xf32> -> vector<1x2xf32>
    %c0_118 = arith.constant 0 : index
    %c0_119 = arith.constant 0 : index
    %358 = vector.load %arg14[%c0_118, %c0_119] : memref<1x1xf32, #tpu.memory_space<vmem>>, vector<1x1xf32>
    %359 = vector.broadcast %358 : vector<1x1xf32> to vector<1x2xf32>
    %360 = arith.addf %357, %359 : vector<1x2xf32>
    %cst_120 = arith.constant 0.000000e+00 : f32
    %361 = vector.broadcast %cst_120 : f32 to vector<1x2xf32>
    %362 = arith.subf %361, %360 : vector<1x2xf32>
    %363 = math.exp %362 : vector<1x2xf32>
    %cst_121 = arith.constant 1.000000e+00 : f32
    %364 = vector.broadcast %cst_121 : f32 to vector<1x2xf32>
    %365 = arith.addf %364, %363 : vector<1x2xf32>
    %cst_122 = arith.constant 1.000000e+00 : f32
    %366 = vector.broadcast %cst_122 : f32 to vector<1x2xf32>
    %367 = arith.divf %366, %365 : vector<1x2xf32>
    %c0_123 = arith.constant 0 : index
    %c0_124 = arith.constant 0 : index
    %368 = vector.load %arg16[%c0_123, %c0_124] : memref<1x2xf32, #tpu.memory_space<vmem>>, vector<1x2xf32>
    tpu.vector_store %arg16[%c0_123, %c0_124], %367 {strides = array<i32>} : memref<1x2xf32, #tpu.memory_space<vmem>>, vector<1x2xf32>,
    return
  }
}

</mosaic_0001>

<bundles_post_ra>
// kernel: relation_module_forward.1
= control target key start
LH: loop header
LB: loop body
LE: loop exit
PB: predicated region body
PF: predicated region fallthrough
CT: control target
= control target key end

     0   :  { %s2851_s0 = inlined_call_operand.vmem [shape: f32[8,128], index: 0, kind: input, shape index: {}]   ;;  %s2852_s1 = inlined_call_operand.vmem [shape: bf16[32,120], index: 1, kind: input, shape index: {}]   ;;  %s2853_s2 = inlined_call_operand.vmem [shape: f32[32,1], index: 2, kind: input, shape index: {}]   ;;  %s2854_s3 = inlined_call_operand.vmem [shape: f32[32,1], index: 3, kind: input, shape index: {}]   ;;  %s2855_s4 = inlined_call_operand.vmem [shape: bf16[64,32], index: 4, kind: input, shape index: {}]   ;;  %s2856_s5 = inlined_call_operand.vmem [shape: bf16[32,224], index: 5, kind: input, shape index: {}]   ;;  %s2857_s6 = inlined_call_operand.vmem [shape: f32[32,1], index: 6, kind: input, shape index: {}]   ;;  %s2858_s7 = inlined_call_operand.vmem [shape: f32[32,1], index: 7, kind: input, shape index: {}]   ;;  %s2859_s8 = inlined_call_operand.vmem [shape: bf16[32,16], index: 8, kind: input, shape index: {}]   ;;  %s2860_s9 = inlined_call_operand.vmem [shape: bf16[32,224], index: 9, kind: input, shape index: {}]   ;;  %s2861_s10 = inlined_call_operand.vmem [shape: f32[32,1], index: 10, kind: input, shape index: {}]   ;;  %s2862_s11 = inlined_call_operand.vmem [shape: f32[32,1], index: 11, kind: input, shape index: {}]   ;;  %s2863_s12 = inlined_call_operand.vmem [shape: bf16[16,8], index: 12, kind: input, shape index: {}]   ;;  %s2864_s13 = inlined_call_operand.vmem [shape: f32[32,16], index: 13, kind: input, shape index: {}]   ;;  %s2865_s14 = inlined_call_operand.<no memory space> [shape: f32[1,1], index: 14, kind: input, shape index: {}]   ;;  %s2866_s15 = inlined_call_operand.vmem [shape: f32[16,2], index: 15, kind: input, shape index: {}]   ;;  %s2867_s16 = inlined_call_operand.hbm [shape: f32[1,2], index: 16, kind: output, shape index: {}]  }
   0x1   :  { %2868 = sst [smem:[#allocation6_spill]] %s2851_s0  ;;  %v21_v0 = vstv %s2865_s14 }
   0x2   :  { %22 = vst [vmem:[#allocation2] sm:$0x1] %v21_v0 }
   0x3   :  { %s2869_s25 = sld [smem:[#allocation6_spill]]  ;;  %s2197_s26 = smov 121  }
   0x4   :  { %s2198_s27 = smov 122   ;;  %s2199_s28 = smov 123  }
   0x5   :  { %s2200_s29 = smov 125   ;;  %s2201_s14 = smov 124  }
   0x6   :  { %s2202_s30 = smov 127   ;;  %s2203_s0 = smov 126  }
   0x7   :  { %s2204_s17 = smov 1  }
   0x9   :  { %v2313_v1 = vld [vmem:[%s2869_s25] sm:$0xff] }
   0xa   :  { %179 = vrot.lane.b32.xlu0 %v2313_v1, %s2197_s26  ;;  %170 = vrot.lane.b32.xlu1 %v2313_v1, %s2198_s27 }
   0xe   :  { %161 = vrot.lane.b32.xlu0 %v2313_v1, %s2199_s28  ;;  %143 = vrot.lane.b32.xlu1 %v2313_v1, %s2200_s29 }
  0x12   :  { %152 = vrot.lane.b32.xlu0 %v2313_v1, %s2201_s14  ;;  %125 = vrot.lane.b32.xlu1 %v2313_v1, %s2202_s30 }
  0x16   :  { %134 = vrot.lane.b32.xlu0 %v2313_v1, %s2203_s0  ;;  %116 = vrot.lane.b32.xlu1 %v2313_v1, %s2204_s17 }
  0x17   :  { %23 = vsyncpa [#allocation4], 0  ;;  %s2205_s18 = smov 2   ;;  %s2206_s19 = smov 3   ;;  %v2126_v2 = vld [vmem:[%s2852_s1] sm:$0xff]   ;;  %vm210_vm0 = vcmask 982016   ;;  %v58_v3 = vlaneseq }
  0x18   :  { %s2207_s20 = smov 4   ;;  %s2208_s21 = smov 5   ;;  %1895 = vmatprep.mubr.msk.bf16.mxu0 %vm210_vm0, %v2126_v2  ;;  %vm182_vm1 = vcmask 990208   ;;  %vm173_vm3 = vcmask 998400   ;;  %vm217_vm4 = vcmask 1043456   ;;  %vm164_vm5 = vcmask 1006592  }
  0x19   :  { %s2209_s24 = smov 6   ;;  %s2210_s25 = smov 7   ;;  %v2340_v4 = vand.u32 127, %v58_v3  ;;  %vm146_vm8 = vcmask 1022976   ;;  %vm155_vm10 = vcmask 1014784   ;;  %vm128_vm13 = vcmask 1039360  }
  0x1a   :  { %107 = vrot.lane.b32.xlu1 %v2313_v1, %s2205_s18  ;;  %98 = vrot.lane.b32.xlu0 %v2313_v1, %s2206_s19  ;;  %vm137_vm15 = vcmask 1031168   ;;  %v2127_v48 = vld [vmem:[%s2852_s1 + $0x8] sm:$0xff]   ;;  %v2212_v57 = vmov 0   ;;  %v2128_v38 = vld [vmem:[%s2855_s4 + $0x18] sm:$0xff]  }
  0x1b   :  { %v2343_v5 = vand.u32 63, %v2340_v4  ;;  %1984 = vset.pattern.permute.xlu1 %v2212_v57  ;;  %1985 = vset.pattern.permute.xlu0 %v2212_v57  ;;  %v307_v28 = vld [vmem:[%s2853_s2 + $0x8] sm:$0xff] }
  0x1c   :  { %1899 = vmatprep.subr.bf16.mxu1 %v2128_v38 }
  0x1d   :  { %vm184_vm2 = vcmp.lt.s32.totalorder %v2343_v5, 57  ;;  %vm166_vm6 = vcmp.lt.s32.totalorder %v2343_v5, 59  ;;  %vm175_vm7 = vcmp.lt.s32.totalorder %v2343_v5, 58  ;;  %vm148_vm11 = vcmp.lt.s32.totalorder %v2343_v5, 61  ;;  %1900 = vmatpush3.bf16.msra.mxu1 %v2128_v38 }
  0x1e   :  { %89 = vrot.lane.b32.xlu1 %v2313_v1, %s2207_s20  ;;  %80 = vrot.lane.b32.xlu0 %v2313_v1, %s2208_s21  ;;  %vm1713_vm9 = vmpackc.low %vm175_vm7, %vm166_vm6  ;;  %vm157_vm12 = vcmp.lt.s32.totalorder %v2343_v5, 60  ;;  %vm110_vm6 = vcmask 15360   ;;  %vm101_vm7 = vcmask 23552  }
  0x1f   :  { %vm2350_vm14 = vmpackc.low %vm157_vm12, %vm148_vm11  ;;  %vm112_vm11 = vcmp.ge.s32.totalorder %v2343_v5, 2  ;;  %vm92_vm12 = vcmask 31744  }
  0x22   :  { %71 = vrot.lane.b32.xlu1 %v2313_v1, %s2209_s24  ;;  %62 = vrot.lane.b32.xlu0 %v2313_v1, %s2210_s25 }
  0x7c   :  { %v180_v6 = vpop.permute.xlu0 %179  ;;  %v171_v7 = vpop.permute.xlu1 %170 }
  0x7d   :  { %v183_v8 = vsel %vm182_vm1, %v180_v6, 0.0  ;;  %v174_v10 = vsel %vm173_vm3, %v171_v7, 0.0  ;;  %vm119_vm1 = vcmask 7168   ;;  %vm139_vm3 = vcmp.lt.s32.totalorder %v2343_v5, 62 }
  0x7e   :  { %v187_v9 = vsel %vm184_vm2, %v183_v8, 0.0  ;;  %vm130_vm2 = vcmp.lt.s32.totalorder %v2343_v5, 63 }
  0x7f   :  { %v195_v11 = vpack.c.bf16 %v187_v9, %v187_v9 }
  0x80   :  { %v162_v12 = vpop.permute.xlu0 %161  ;;  %v144_v13 = vpop.permute.xlu1 %143 }
  0x81   :  { %1958 = vmatprep.subr.msk.bf16.mxu0 %vm217_vm4, %v195_v11  ;;  %v165_v14 = vsel %vm164_vm5, %v162_v12, 0.0  ;;  %v219_v15 = vsel %vm217_vm4, %v195_v11, 0  ;;  %v147_v17 = vsel %vm146_vm8, %v144_v13, 0.0  ;;  %vm2359_vm4 = vmpackc.low %vm139_vm3, %vm130_vm2  ;;  %vm121_vm5 = vcmp.ge.s32.totalorder %v2343_v5, 1 }
  0x82   :  { %v1714_v16 = vpack.c.bf16 %v174_v10, %v165_v14  ;;  %1880 = vmatpush3.bf16.msra.mxu0 %v219_v15  ;;  %vm2211_vm8 = vmmov 1   ;;  %vm94_vm2 = vcmp.ge.s32.totalorder %v2343_v5, 4  ;;  %vm74_vm3 = vcmask 48128  }
  0x84   :  { %1881 = vmatprep.subr.msk.bf16.mxu0 %vm1713_vm9, %v1714_v16  ;;  %v153_v18 = vpop.permute.xlu0 %152  ;;  %v126_v19 = vpop.permute.xlu1 %125 }
  0x85   :  { %v156_v20 = vsel %vm155_vm10, %v153_v18, 0.0  ;;  %v129_v23 = vsel %vm128_vm13, %v126_v19, 0.0  ;;  %vm103_vm10 = vcmp.ge.s32.totalorder %v2343_v5, 3  ;;  %vm83_vm13 = vcmask 39936  }
  0x86   :  { %v1717_v22 = vpack.c.bf16 %v156_v20, %v147_v17  ;;  %1882 = vmatpush3.bf16.msk.msra.mxu0 %vm1713_vm9, %v1714_v16  ;;  %vm2369_vm9 = vmpackc.low %vm2211_vm8, %vm121_vm5  ;;  %vm67_vm8 = vcmp.ge.s32.totalorder %v2343_v5, 7 }
  0x88   :  { %1883 = vmatprep.subr.msk.bf16.mxu0 %vm2350_vm14, %v1717_v22  ;;  %v135_v24 = vpop.permute.xlu0 %134  ;;  %v117_v25 = vpop.permute.xlu1 %116 }
  0x89   :  { %v138_v26 = vsel %vm137_vm15, %v135_v24, 0.0  ;;  %v120_v27 = vsel %vm119_vm1, 0.0, %v117_v25  ;;  %vm85_vm15 = vcmp.ge.s32.totalorder %v2343_v5, 5  ;;  %v306_v24 = vld [vmem:[%s2853_s2] sm:$0xff] }
  0x8a   :  { %v1720_v29 = vpack.c.bf16 %v138_v26, %v129_v23  ;;  %1884 = vmatpush3.bf16.msk.msra.mxu0 %vm2350_vm14, %v1717_v22  ;;  %v1723_v30 = vpack.c.bf16 %v2313_v1, %v120_v27  ;;  %vm2381_vm14 = vmpackc.low %vm112_vm11, %vm103_vm10  ;;  %vm76_vm10 = vcmp.ge.s32.totalorder %v2343_v5, 6  ;;  %v308_v27 = vld [vmem:[%s2853_s2 + $0x10] sm:$0xff]  ;;  %vm553_vm11 = vcmask 261120  }
  0x8b   :  { %vm1728_vm5 = vmpackc.low %vm94_vm2, %vm85_vm15 }
  0x8c   :  { %1885 = vmatprep.subr.msk.bf16.mxu0 %vm2359_vm4, %v1720_v29  ;;  %v108_v31 = vpop.permute.xlu1 %107  ;;  %v99_v33 = vpop.permute.xlu0 %98 }
  0x8d   :  { %v111_v34 = vsel %vm110_vm6, 0.0, %v108_v31  ;;  %v102_v35 = vsel %vm101_vm7, 0.0, %v99_v33  ;;  %v309_v33 = vld [vmem:[%s2853_s2 + $0x18] sm:$0xff] }
  0x8e   :  { %1886 = vmatpush3.bf16.msk.msra.mxu0 %vm2359_vm4, %v1720_v29  ;;  %v1726_v36 = vpack.c.bf16 %v111_v34, %v102_v35  ;;  %vm65_vm4 = vcmask 56320  }
  0x8f   :  { %1887 = vmatprep.subr.msk.bf16.mxu0 %vm2369_vm9, %v1723_v30 }
  0x90   :  { %v90_v37 = vpop.permute.xlu1 %89  ;;  %v81_v39 = vpop.permute.xlu0 %80 }
  0x91   :  { %v93_v40 = vsel %vm92_vm12, 0.0, %v90_v37  ;;  %v84_v41 = vsel %vm83_vm13, 0.0, %v81_v39  ;;  %v324_v37 = vld [vmem:[%s2854_s3 + $0x10] sm:$0xff]  ;;  %vm740_vm12 = vcmask 785408  }
  0x92   :  { %1888 = vmatpush3.bf16.msk.msra.mxu0 %vm2369_vm9, %v1723_v30  ;;  %v1729_v42 = vpack.c.bf16 %v93_v40, %v84_v41  ;;  %vm1731_vm9 = vmpackc.low %vm76_vm10, %vm67_vm8  ;;  %v322_v41 = vld [vmem:[%s2854_s3] sm:$0xff] }
  0x93   :  { %1889 = vmatprep.subr.msk.bf16.mxu0 %vm2381_vm14, %v1726_v36 }
  0x94   :  { %v72_v43 = vpop.permute.xlu1 %71  ;;  %v63_v44 = vpop.permute.xlu0 %62 }
  0x95   :  { %v75_v45 = vsel %vm74_vm3, 0.0, %v72_v43  ;;  %v66_v46 = vsel %vm65_vm4, 0.0, %v63_v44 }
  0x96   :  { %1890 = vmatpush3.bf16.msk.msra.mxu0 %vm2381_vm14, %v1726_v36  ;;  %v1732_v47 = vpack.c.bf16 %v75_v45, %v66_v46  ;;  %v323_v45 = vld [vmem:[%s2854_s3 + $0x8] sm:$0xff] }
  0x97   :  { %1891 = vmatprep.subr.msk.bf16.mxu0 %vm1728_vm5, %v1729_v42  ;;  %v2130_v46 = vld [vmem:[%s2855_s4 + $0x8] sm:$0xff]  }
  0x9a   :  { %1892 = vmatpush3.bf16.msk.msra.mxu0 %vm1728_vm5, %v1729_v42  ;;  %v2129_v42 = vld [vmem:[%s2855_s4 + $0x10] sm:$0xff]   ;;  %vm692_vm5 = vcmask 498688  }
  0x9b   :  { %1893 = vmatprep.subr.msk.bf16.mxu0 %vm1731_vm9, %v1732_v47  ;;  %1901 = vmatprep.subr.bf16.mxu1 %v2129_v42 }
  0x9c   :  { %1902 = vmatpush3.bf16.msra.mxu1 %v2129_v42 }
  0x9d   :  { %1903 = vmatprep.subr.bf16.mxu1 %v2130_v46 }
  0x9e   :  { %1894 = vmatpush3.bf16.msk.msra.mxu0 %vm1731_vm9, %v1732_v47  ;;  %vm668_vm9 = vcmask 506880  }
  0x9f   :  { %747 = vmatprep.subr.bf16.mxu0 %v2212_v57 }
  0xa0   :  { %1904 = vmatpush3.bf16.msra.mxu1 %v2130_v46 }
  0xa1   :  { %1896 = vmatmul.mubr.msk.bf16.vlgmr.msra.gmra.mxu0 %vm210_vm0, %v2127_v48  ;;  %vm420_vm0 = vcmask 523264  }
 0x161   :  { %v2399_v49 = vpop.f32.mrf.mxu0 }
 0x162   :  { %274 = vadd.xlane.f32.xlu0 %v2399_v49  ;;  %v284_v54 = vmul.f32 %v2399_v49, %v2399_v49 }
 0x163   :  { %v2402_v50 = vpop.f32.mrf.mxu0 }
 0x164   :  { %v282_v51 = vmul.f32 %v2402_v50, %v2402_v50 }
 0x165   :  { %v2406_v52 = vpop.f32.mrf.mxu0 }
 0x166   :  { %270 = vadd.xlane.f32.xlu0 %v2402_v50  ;;  %286 = vadd.xlane.f32.xlu1 %v282_v51  ;;  %v285_v56 = vmul.f32 %v2406_v52, %v2406_v52  ;;  %v325_v51 = vld [vmem:[%s2854_s3 + $0x18] sm:$0xff]  ;;  %s2213_s3 = smov 64  }
 0x167   :  { %v2409_v53 = vpop.f32.mrf.mxu0 }
 0x168   :  { %v283_v55 = vmul.f32 %v2409_v53, %v2409_v53 }
 0x16a   :  { %276 = vadd.xlane.f32.xlu0 %v2406_v52  ;;  %272 = vadd.xlane.f32.xlu1 %v2409_v53 }
 0x16e   :  { %290 = vadd.xlane.f32.xlu1 %v284_v54  ;;  %288 = vadd.xlane.f32.xlu0 %v283_v55  ;;  %v2131_v54 = vld [vmem:[%s2855_s4] sm:$0xff]   ;;  %s2214_s4 = smov 32  }
 0x16f   :  { %1905 = vmatprep.subr.bf16.mxu1 %v2131_v54 }
 0x170   :  { %1906 = vmatpush3.bf16.msra.mxu1 %v2131_v54 }
 0x171   :  { %1911 = vmatprep.subr.bf16.mxu1 %v2128_v38 }
 0x172   :  { %292 = vadd.xlane.f32.xlu0 %v285_v56 }
 0x1eb   :  { %v275_v58 = vpop.xlane.xlu0 %274 }
 0x1ec   :  { %v280_v0 = vmul.f32 0.0078125, %v275_v58 }
 0x1ee   :  { %v300_v8 = vmul.f32 %v280_v0, %v280_v0 }
 0x1ef   :  { %v271_v59 = vpop.xlane.xlu0 %270  ;;  %v287_v60 = vpop.xlane.xlu1 %286 }
 0x1f0   :  { %v278_v61 = vmul.f32 0.0078125, %v271_v59  ;;  %v294_v63 = vmul.f32 0.0078125, %v287_v60 }
 0x1f2   :  { %v298_v62 = vmul.f32 %v278_v61, %v278_v61 }
 0x1f3   :  { %v277_v1 = vpop.xlane.xlu0 %276  ;;  %v273_v2 = vpop.xlane.xlu1 %272 }
 0x1f4   :  { %v302_v5 = vsub.f32 %v294_v63, %v298_v62  ;;  %v279_v6 = vmul.f32 0.0078125, %v273_v2  ;;  %v281_v9 = vmul.f32 0.0078125, %v277_v1 }
 0x1f6   :  { %v310_v7 = vadd.f32 1e-05, %v302_v5  ;;  %v299_v12 = vmul.f32 %v279_v6, %v279_v6  ;;  %v301_v18 = vmul.f32 %v281_v9, %v281_v9 }
 0x1f7   :  { %v291_v10 = vpop.xlane.xlu1 %290  ;;  %v289_v11 = vpop.xlane.xlu0 %288 }
 0x1f8   :  { %2147 = vrsqrt.f32 %v310_v7  ;;  %v296_v13 = vmul.f32 0.0078125, %v291_v10  ;;  %v295_v14 = vmul.f32 0.0078125, %v289_v11 }
 0x1fa   :  { %v304_v15 = vsub.f32 %v296_v13, %v300_v8  ;;  %v303_v16 = vsub.f32 %v295_v14, %v299_v12 }
 0x1fb   :  { %v293_v17 = vpop.xlane.xlu0 %292 }
 0x1fc   :  { %v312_v19 = vadd.f32 1e-05, %v304_v15  ;;  %v311_v20 = vadd.f32 1e-05, %v303_v16  ;;  %v297_v21 = vmul.f32 0.0078125, %v293_v17 }
 0x1fe   :  { %2149 = vrsqrt.f32 %v312_v19  ;;  %v305_v22 = vsub.f32 %v297_v21, %v301_v18 }
 0x1ff   :  { %2151 = vrsqrt.f32 %v311_v20 }
 0x200   :  { %v313_v23 = vadd.f32 1e-05, %v305_v22 }
 0x202   :  { %2153 = vrsqrt.f32 %v313_v23 }
 0x205   :  { %v2148_v25 = vpop.eup %2147 }
 0x206   :  { %v318_v26 = vmul.f32 %v2148_v25, %v306_v24 }
 0x208   :  { %336 = vperm.xlu1 %1984, %v318_v26   ;;  %v326_v40 = vmul.f32 %v318_v26, %v278_v61 }
 0x20a   :  { %v330_v43 = vsub.f32 %v322_v41, %v326_v40  ;;  %v2489_v40 = vand.u32 31, %v2340_v4 }
 0x20b   :  { %v2150_v29 = vpop.eup %2149 }
 0x20c   :  { %v2152_v30 = vpop.eup %2151  ;;  %v320_v31 = vmul.f32 %v2150_v29, %v308_v27  ;;  %vm625_vm13 = vcmp.ge.s32.totalorder %v2489_v40, 1  ;;  %vm602_vm15 = vcmp.ge.s32.totalorder %v2489_v40, 2  ;;  %vm579_vm3 = vcmp.ge.s32.totalorder %v2489_v40, 3 }
 0x20d   :  { %v319_v32 = vmul.f32 %v2152_v30, %v307_v28  ;;  %vm2494_vm14 = vmpackc.low %vm625_vm13, %vm625_vm13  ;;  %vm697_vm8 = vcmp.lt.s32.totalorder %v2489_v40, 29  ;;  %vm673_vm13 = vcmp.lt.s32.totalorder %v2489_v40, 30 }
 0x20e   :  { %346 = vperm.xlu1 %1984, %v320_v31   ;;  %v328_v36 = vmul.f32 %v320_v31, %v280_v0  ;;  %vm2509_vm2 = vmpackc.low %vm602_vm15, %vm602_vm15  ;;  %vm644_vm15 = vcmask 515072  }
 0x20f   :  { %v2154_v34 = vpop.eup %2153  ;;  %341 = vperm.xlu0 %1985, %v319_v32   ;;  %v327_v44 = vmul.f32 %v319_v32, %v279_v6  ;;  %vm2524_vm4 = vmpackc.low %vm579_vm3, %vm579_vm3 }
 0x210   :  { %v321_v35 = vmul.f32 %v2154_v34, %v309_v33  ;;  %v332_v39 = vsub.f32 %v324_v37, %v328_v36  ;;  %vm2539_vm10 = vmpackc.low %vm697_vm8, %vm697_vm8 }
 0x211   :  { %v331_v47 = vsub.f32 %v323_v45, %v327_v44 }
 0x212   :  { %351 = vperm.xlu1 %1984, %v321_v35   ;;  %v329_v48 = vmul.f32 %v321_v35, %v281_v9 }
 0x214   :  { %v333_v55 = vsub.f32 %v325_v51, %v329_v48 }
 0x216   :  { %370 = vperm.xlu1 %1984, %v332_v39   ;;  %v2132_v39 = vld [vmem:[%s2856_s5 + $0x4] ss:$8 sps:$4 sm:$0xff]  }
 0x217   :  { %1784 = vmatprep.mubr.msk.bf16.mxu0 %vm740_vm12, %v2132_v39 }
 0x21a   :  { %360 = vperm.xlu1 %1984, %v330_v43  }
 0x21e   :  { %365 = vperm.xlu1 %1984, %v331_v47  }
 0x222   :  { %375 = vperm.xlu1 %1984, %v333_v55  }
 0x283   :  { %v337_v56 = vpop.permute.xlu1 %336 }
 0x284   :  { %v354_v63 = vmul.f32 %v337_v56, %v2402_v50 }
 0x289   :  { %v347_v58 = vpop.permute.xlu1 %346 }
 0x28a   :  { %v342_v61 = vpop.permute.xlu0 %341  ;;  %v356_v5 = vmul.f32 %v2399_v49, %v347_v58 }
 0x28b   :  { %v355_v0 = vmul.f32 %v342_v61, %v2409_v53 }
 0x28d   :  { %v352_v59 = vpop.permute.xlu1 %351 }
 0x28e   :  { %v357_v7 = vmul.f32 %v2406_v52, %v352_v59 }
 0x291   :  { %v371_v60 = vpop.permute.xlu1 %370 }
 0x292   :  { %v380_v8 = vadd.f32 %v371_v60, %v356_v5 }
 0x294   :  { %v384_v14 = vmax.f32 %v380_v8, 0.0 }
 0x295   :  { %v361_v62 = vpop.permute.xlu1 %360 }
 0x296   :  { %v378_v1 = vadd.f32 %v361_v62, %v354_v63 }
 0x298   :  { %v382_v9 = vmax.f32 %v378_v1, 0.0 }
 0x299   :  { %v366_v2 = vpop.permute.xlu1 %365 }
 0x29a   :  { %v379_v6 = vadd.f32 %v366_v2, %v355_v0 }
 0x29c   :  { %v383_v10 = vmax.f32 %v379_v6, 0.0 }
 0x29d   :  { %v376_v11 = vpop.permute.xlu1 %375 }
 0x29e   :  { %v386_v12 = vpack.c.bf16 %v383_v10, %v382_v9  ;;  %v381_v13 = vadd.f32 %v376_v11, %v357_v7 }
 0x2a0   :  { %v385_v15 = vmax.f32 %v381_v13, 0.0  ;;  %478 = vrot.lane.b32.xlu1 %v386_v12, %s2213_s3  ;;  %1907 = vmatprep.mubr.msk.bf16.mxu1 %vm420_vm0, %v386_v12 }
 0x2a2   :  { %v387_v50 = vpack.c.bf16 %v385_v15, %v384_v14 }
 0x2a4   :  { %480 = vrot.lane.b32.xlu1 %v387_v50, %s2213_s3  ;;  %1908 = vmatmul.mubr.msk.bf16.vlgmr.msra.gmra.mxu1 %vm420_vm0, %v387_v50 }
 0x2a5   :  { %1912 = vmatpush3.bf16.msra.mxu1 %v2128_v38 }
 0x2a6   :  { %1913 = vmatprep.subr.bf16.mxu1 %v2129_v42 }
 0x2a9   :  { %1914 = vmatpush3.bf16.msra.mxu1 %v2129_v42 }
 0x2aa   :  { %1915 = vmatprep.subr.bf16.mxu1 %v2130_v46 }
 0x2ad   :  { %1916 = vmatpush3.bf16.msra.mxu1 %v2130_v46 }
 0x2ae   :  { %1917 = vmatprep.subr.bf16.mxu1 %v2131_v54 }
 0x2b1   :  { %1918 = vmatpush3.bf16.msra.mxu1 %v2131_v54 }
 0x312   :  { %v479_v49 = vpop.permute.xlu1 %478 }
 0x313   :  { %1919 = vmatprep.mubr.msk.bf16.mxu1 %vm420_vm0, %v479_v49 }
 0x316   :  { %v481_v52 = vpop.permute.xlu1 %480 }
 0x317   :  { %1920 = vmatmul.mubr.msk.bf16.vlgmr.msra.gmra.mxu1 %vm420_vm0, %v481_v52 }
 0x364   :  { %v1909_v53 = vpop.f32.mrf.mxu1 }
 0x366   :  { %v461_v16 = vpop.f32.mrf.mxu1 }
 0x368   :  { %v1910_v17 = vpop.f32.mrf.mxu1 }
 0x36a   :  { %v464_v18 = vpop.f32.mrf.mxu1 }
 0x3d7   :  { %v1921_v19 = vpop.f32.mrf.mxu1 }
 0x3d9   :  { %v522_v20 = vpop.f32.mrf.mxu1 }
 0x3db   :  { %v1922_v21 = vpop.f32.mrf.mxu1 }
 0x3dc   :  { %v1986_v22 = vpack.i.bf16 %v1922_v21, %v1921_v19 }
 0x3dd   :  { %v525_v23 = vpop.f32.mrf.mxu1 }
 0x3de   :  { %v1991_v24 = vpack.i.bf16 %v525_v23, %v522_v20  ;;  %1987 = vrot.lane.b32.xlu0 %v1986_v22, %s2214_s4 }
 0x3e0   :  { %1992 = vrot.lane.b32.xlu1 %v1991_v24, %s2214_s4 }
 0x450   :  { %v1988_v25 = vpop.permute.xlu0 %1987 }
 0x451   :  { %v1990_v26 = vunpack.i.h.bf16 %v1988_v25  ;;  %v1989_v27 = vunpack.i.l.bf16 %v1988_v25 }
 0x452   :  { %v1993_v28 = vpop.permute.xlu1 %1992 }
 0x453   :  { %v557_v29 = vsel %vm553_vm11, %v1910_v17, %v1990_v26  ;;  %v556_v30 = vsel %vm553_vm11, %v1909_v53, %v1989_v27  ;;  %v1995_v31 = vunpack.i.h.bf16 %v1993_v28  ;;  %v1994_v32 = vunpack.i.l.bf16 %v1993_v28 }
 0x454   :  { %v1996_v33 = vpack.i.bf16 %v557_v29, %v556_v30  ;;  %v711_v34 = vpack.c.bf16 %v557_v29, %v556_v30 }
 0x455   :  { %v555_v35 = vsel %vm553_vm11, %v464_v18, %v1995_v31  ;;  %v554_v36 = vsel %vm553_vm11, %v461_v16, %v1994_v32 }
 0x456   :  { %1997 = vrot.lane.b32.xlu0 %v1996_v33, %s2204_s17  ;;  %748 = vmatpush1.bf16.msra.mxu0 %v711_v34  ;;  %v2001_v37 = vpack.i.bf16 %v555_v35, %v554_v36  ;;  %v710_v38 = vpack.c.bf16 %v555_v35, %v554_v36 }
 0x457   :  { %749 = vmatprep.subr.bf16.mxu0 %v2212_v57 }
 0x458   :  { %2002 = vrot.lane.b32.xlu1 %v2001_v37, %s2204_s17 }
 0x45a   :  { %2007 = vrot.lane.b32.xlu0 %v1996_v33, %s2205_s18  ;;  %750 = vmatpush1.bf16.msra.mxu0 %v710_v38 }
 0x45b   :  { %751 = vmatprep.subr.bf16.mxu0 %v2212_v57 }
 0x45c   :  { %2012 = vrot.lane.b32.xlu1 %v2001_v37, %s2205_s18 }
 0x45e   :  { %2017 = vrot.lane.b32.xlu0 %v1996_v33, %s2206_s19 }
 0x460   :  { %2022 = vrot.lane.b32.xlu1 %v2001_v37, %s2206_s19 }
 0x462   :  { %2027 = vrot.lane.b32.xlu0 %v1996_v33, %s2200_s29 }
 0x464   :  { %2032 = vrot.lane.b32.xlu1 %v2001_v37, %s2200_s29 }
 0x466   :  { %2037 = vrot.lane.b32.xlu0 %v1996_v33, %s2203_s0 }
 0x468   :  { %2042 = vrot.lane.b32.xlu1 %v2001_v37, %s2203_s0 }
 0x46a   :  { %2047 = vrot.lane.b32.xlu0 %v1996_v33, %s2202_s30 }
 0x46c   :  { %2052 = vrot.lane.b32.xlu1 %v2001_v37, %s2202_s30 }
 0x4c8   :  { %v1998_v41 = vpop.permute.xlu0 %1997 }
 0x4c9   :  { %v2000_v42 = vunpack.i.h.bf16 %v1998_v41  ;;  %v1999_v43 = vunpack.i.l.bf16 %v1998_v41 }
 0x4ca   :  { %v2003_v44 = vpop.permute.xlu1 %2002 }
 0x4cb   :  { %v624_v45 = vsel %vm119_vm1, 0.0, %v2000_v42  ;;  %v623_v46 = vsel %vm119_vm1, 0.0, %v1999_v43  ;;  %v2005_v47 = vunpack.i.h.bf16 %v2003_v44  ;;  %v2004_v48 = vunpack.i.l.bf16 %v2003_v44 }
 0x4cc   :  { %v1749_v54 = vpack.c.bf16 %v624_v45, %v623_v46  ;;  %v2008_v55 = vpop.permute.xlu0 %2007 }
 0x4cd   :  { %v622_v56 = vsel %vm119_vm1, 0.0, %v2005_v47  ;;  %v621_v58 = vsel %vm119_vm1, 0.0, %v2004_v48  ;;  %v2010_v59 = vunpack.i.h.bf16 %v2008_v55  ;;  %v2009_v60 = vunpack.i.l.bf16 %v2008_v55 }
 0x4ce   :  { %v2013_v61 = vpop.permute.xlu1 %2012  ;;  %1750 = vmatpush1.bf16.msk.msra.mxu0 %vm2494_vm14, %v1749_v54  ;;  %v1752_v62 = vpack.c.bf16 %v622_v56, %v621_v58 }
 0x4cf   :  { %753 = vmatprep.subr.bf16.mxu0 %v2212_v57  ;;  %v601_v63 = vsel %vm110_vm6, 0.0, %v2010_v59  ;;  %v600_v0 = vsel %vm110_vm6, 0.0, %v2009_v60  ;;  %v2015_v1 = vunpack.i.h.bf16 %v2013_v61  ;;  %v2014_v2 = vunpack.i.l.bf16 %v2013_v61 }
 0x4d0   :  { %v2018_v5 = vpop.permute.xlu0 %2017  ;;  %v1755_v7 = vpack.c.bf16 %v601_v63, %v600_v0  ;;  %v2135_v63 = vld [vmem:[%s2856_s5 + $0x14] ss:$8 sps:$4 sm:$0xff]   ;;  %v2137_v0 = vld [vmem:[%s2856_s5 + $0x10] ss:$8 sps:$4 sm:$0xff]  }
 0x4d1   :  { %v599_v8 = vsel %vm110_vm6, 0.0, %v2015_v1  ;;  %v598_v9 = vsel %vm110_vm6, 0.0, %v2014_v2  ;;  %v2020_v10 = vunpack.i.h.bf16 %v2018_v5  ;;  %v2019_v11 = vunpack.i.l.bf16 %v2018_v5 }
 0x4d2   :  { %1753 = vmatpush1.bf16.msk.msra.mxu0 %vm2494_vm14, %v1752_v62  ;;  %v2023_v12 = vpop.permute.xlu1 %2022  ;;  %v1758_v13 = vpack.c.bf16 %v599_v8, %v598_v9  ;;  %vm2554_vm14 = vmpackc.low %vm673_vm13, %vm673_vm13 }
 0x4d3   :  { %755 = vmatprep.subr.bf16.mxu0 %v2212_v57  ;;  %v578_v14 = vsel %vm101_vm7, 0.0, %v2020_v10  ;;  %v577_v15 = vsel %vm101_vm7, 0.0, %v2019_v11  ;;  %v2025_v50 = vunpack.i.h.bf16 %v2023_v12  ;;  %v2024_v49 = vunpack.i.l.bf16 %v2023_v12 }
 0x4d4   :  { %v2028_v52 = vpop.permute.xlu0 %2027  ;;  %v1761_v16 = vpack.c.bf16 %v578_v14, %v577_v15 }
 0x4d5   :  { %v576_v17 = vsel %vm101_vm7, 0.0, %v2025_v50  ;;  %v575_v18 = vsel %vm101_vm7, 0.0, %v2024_v49  ;;  %v2030_v19 = vunpack.i.h.bf16 %v2028_v52  ;;  %v2029_v20 = vunpack.i.l.bf16 %v2028_v52 }
 0x4d6   :  { %1756 = vmatpush1.bf16.msk.msra.mxu0 %vm2509_vm2, %v1755_v7  ;;  %v2033_v21 = vpop.permute.xlu1 %2032  ;;  %v1764_v22 = vpack.c.bf16 %v576_v17, %v575_v18 }
 0x4d7   :  { %757 = vmatprep.subr.bf16.mxu0 %v2212_v57  ;;  %v696_v23 = vsel %vm692_vm5, %v2030_v19, 0.0  ;;  %v695_v24 = vsel %vm692_vm5, %v2029_v20, 0.0  ;;  %v2035_v25 = vunpack.i.h.bf16 %v2033_v21  ;;  %v2034_v26 = vunpack.i.l.bf16 %v2033_v21 }
 0x4d8   :  { %v2038_v27 = vpop.permute.xlu0 %2037  ;;  %v1767_v29 = vpack.c.bf16 %v696_v23, %v695_v24 }
 0x4d9   :  { %v694_v30 = vsel %vm692_vm5, %v2035_v25, 0.0  ;;  %v693_v31 = vsel %vm692_vm5, %v2034_v26, 0.0  ;;  %v2040_v32 = vunpack.i.h.bf16 %v2038_v27  ;;  %v2039_v33 = vunpack.i.l.bf16 %v2038_v27 }
 0x4da   :  { %1759 = vmatpush1.bf16.msk.msra.mxu0 %vm2509_vm2, %v1758_v13  ;;  %v2043_v34 = vpop.permute.xlu1 %2042  ;;  %v1770_v35 = vpack.c.bf16 %v694_v30, %v693_v31  ;;  %vm649_vm2 = vcmp.lt.s32.totalorder %v2489_v40, 31  ;;  %v2134_v40 = vld [vmem:[%s2856_s5] ss:$8 sps:$4 sm:$0xff]  }
 0x4db   :  { %759 = vmatprep.subr.bf16.mxu0 %v2212_v57  ;;  %v672_v36 = vsel %vm668_vm9, %v2040_v32, 0.0  ;;  %v671_v37 = vsel %vm668_vm9, %v2039_v33, 0.0  ;;  %v2045_v38 = vunpack.i.h.bf16 %v2043_v34  ;;  %v2044_v39 = vunpack.i.l.bf16 %v2043_v34  ;;  %vm1778_vm3 = vmpackc.low %vm649_vm2, %vm649_vm2 }
 0x4dc   :  { %v2048_v41 = vpop.permute.xlu0 %2047  ;;  %v1773_v43 = vpack.c.bf16 %v672_v36, %v671_v37 }
 0x4dd   :  { %v670_v44 = vsel %vm668_vm9, %v2045_v38, 0.0  ;;  %v669_v45 = vsel %vm668_vm9, %v2044_v39, 0.0  ;;  %v2050_v46 = vunpack.i.h.bf16 %v2048_v41  ;;  %v2049_v47 = vunpack.i.l.bf16 %v2048_v41 }
 0x4de   :  { %1762 = vmatpush1.bf16.msk.msra.mxu0 %vm2524_vm4, %v1761_v16  ;;  %v2053_v48 = vpop.permute.xlu1 %2052  ;;  %v1776_v51 = vpack.c.bf16 %v670_v44, %v669_v45  ;;  %vm1209_vm9 = vcmask 236544  }
 0x4df   :  { %761 = vmatprep.subr.bf16.mxu0 %v2212_v57  ;;  %v648_v54 = vsel %vm644_vm15, %v2050_v46, 0.0  ;;  %v647_v55 = vsel %vm644_vm15, %v2049_v47, 0.0  ;;  %v2055_v56 = vunpack.i.h.bf16 %v2053_v48  ;;  %v2054_v58 = vunpack.i.l.bf16 %v2053_v48  ;;  %v840_v46 = vld [vmem:[%s2857_s6] sm:$0xff] }
 0x4e0   :  { %v1779_v59 = vpack.c.bf16 %v648_v54, %v647_v55  ;;  %v841_v55 = vld [vmem:[%s2857_s6 + $0x8] sm:$0xff] }
 0x4e1   :  { %v646_v60 = vsel %vm644_vm15, %v2055_v56, 0.0  ;;  %v645_v61 = vsel %vm644_vm15, %v2054_v58, 0.0 }
 0x4e2   :  { %1765 = vmatpush1.bf16.msk.msra.mxu0 %vm2524_vm4, %v1764_v22  ;;  %v1782_v62 = vpack.c.bf16 %v646_v60, %v645_v61  ;;  %v842_v60 = vld [vmem:[%s2857_s6 + $0x10] sm:$0xff]  ;;  %v856_v61 = vld [vmem:[%s2858_s7] sm:$0xff] }
 0x4e3   :  { %767 = vmatprep.subr.bf16.mxu0 %v2212_v57 }
 0x4e6   :  { %1768 = vmatpush2.bf16.msk.msra.mxu0 %vm2539_vm10, %v1767_v29 }
 0x4e7   :  { %769 = vmatprep.subr.bf16.mxu0 %v2212_v57 }
 0x4ea   :  { %1771 = vmatpush2.bf16.msk.msra.mxu0 %vm2539_vm10, %v1770_v35 }
 0x4eb   :  { %771 = vmatprep.subr.bf16.mxu0 %v2212_v57 }
 0x4ee   :  { %1774 = vmatpush2.bf16.msk.msra.mxu0 %vm2554_vm14, %v1773_v43 }
 0x4ef   :  { %773 = vmatprep.subr.bf16.mxu0 %v2212_v57 }
 0x4f2   :  { %1777 = vmatpush2.bf16.msk.msra.mxu0 %vm2554_vm14, %v1776_v51  ;;  %vm1185_vm14 = vcmask 244736  }
 0x4f3   :  { %775 = vmatprep.subr.bf16.mxu0 %v2212_v57 }
 0x4f6   :  { %1780 = vmatpush2.bf16.msk.msra.mxu0 %vm1778_vm3, %v1779_v59 }
 0x4f7   :  { %777 = vmatprep.subr.bf16.mxu0 %v2212_v57 }
 0x4fa   :  { %1783 = vmatpush2.bf16.msk.msra.mxu0 %vm1778_vm3, %v1782_v62  ;;  %vm1161_vm3 = vcmask 252928  }
 0x4fd   :  { %780 = vmatmul.mubr.bf16.vlgmr.msra.gmra.mxu0 %v2134_v40 }
 0x4fe   :  { %1785 = vmatprep.mubr.msk.bf16.mxu0 %vm740_vm12, %v2135_v63 }
 0x505   :  { %788 = vmatmul.mubr.bf16.gmra.mxu0 %v2137_v0 }
 0x5bd   :  { %v2578_v1 = vpop.f32.mrf.mxu0 }
 0x5be   :  { %v796_v2 = vsel %vm420_vm0, %v2578_v1, 0.0  ;;  %v812_v5 = vmul.f32 %v2578_v1, %v2578_v1 }
 0x5bf   :  { %797 = vadd.xlane.f32.xlu0 %v796_v2  ;;  %v783_v6 = vpop.f32.mrf.mxu0  ;;  %v857_v2 = vld [vmem:[%s2858_s7 + $0x8] sm:$0xff] }
 0x5c0   :  { %v816_v7 = vsel %vm420_vm0, %v812_v5, 0.0  ;;  %v858_v5 = vld [vmem:[%s2858_s7 + $0x10] sm:$0xff] }
 0x5c1   :  { %817 = vadd.xlane.f32.xlu1 %v816_v7  ;;  %v2585_v8 = vpop.f32.mrf.mxu0  ;;  %v843_v7 = vld [vmem:[%s2857_s6 + $0x18] sm:$0xff] }
 0x5c2   :  { %v813_v9 = vmul.f32 %v2585_v8, %v2585_v8  ;;  %v799_v12 = vsel %vm420_vm0, %v2585_v8, 0.0 }
 0x5c3   :  { %v786_v10 = vpop.f32.mrf.mxu0 }
 0x5c4   :  { %v819_v11 = vsel %vm420_vm0, %v813_v9, 0.0 }
 0x5c5   :  { %820 = vadd.xlane.f32.xlu0 %v819_v11  ;;  %800 = vadd.xlane.f32.xlu1 %v799_v12  ;;  %v2592_v13 = vpop.f32.mrf.mxu0 }
 0x5c6   :  { %v802_v14 = vsel %vm420_vm0, %v2592_v13, 0.0  ;;  %v814_v15 = vmul.f32 %v2592_v13, %v2592_v13 }
 0x5c7   :  { %v791_v50 = vpop.f32.mrf.mxu0 }
 0x5c8   :  { %v822_v49 = vsel %vm420_vm0, %v814_v15, 0.0  ;;  %v859_v50 = vld [vmem:[%s2858_s7 + $0x18] sm:$0xff]  ;;  %s2215_s7 = smov 96  }
 0x5c9   :  { %803 = vadd.xlane.f32.xlu0 %v802_v14  ;;  %v2599_v52 = vpop.f32.mrf.mxu0  ;;  %823 = vadd.xlane.f32.xlu1 %v822_v49  ;;  %v2138_v14 = vld [vmem:[%s2859_s8 + $0x8] sm:$0xff]  }
 0x5ca   :  { %v805_v16 = vsel %vm420_vm0, %v2599_v52, 0.0  ;;  %v815_v17 = vmul.f32 %v2599_v52, %v2599_v52  ;;  %1923 = vmatprep.subr.bf16.mxu1 %v2138_v14 }
 0x5cb   :  { %v794_v53 = vpop.f32.mrf.mxu0  ;;  %1924 = vmatpush3.bf16.msra.mxu1 %v2138_v14 }
 0x5cc   :  { %v825_v18 = vsel %vm420_vm0, %v815_v17, 0.0  ;;  %v2139_v53 = vld [vmem:[%s2859_s8] sm:$0xff]   ;;  %s2216_s8 = smov 16   ;;  %vm1070_vm0 = vcmask 130048  }
 0x5cd   :  { %806 = vadd.xlane.f32.xlu0 %v805_v16  ;;  %1925 = vmatprep.subr.bf16.mxu1 %v2139_v53 }
 0x5cf   :  { %1926 = vmatpush3.bf16.msra.mxu1 %v2139_v53 }
 0x5d0   :  { %1931 = vmatprep.subr.bf16.mxu1 %v2138_v14 }
 0x5d1   :  { %826 = vadd.xlane.f32.xlu0 %v825_v18 }
 0x648   :  { %v798_v19 = vpop.xlane.xlu0 %797 }
 0x649   :  { %v808_v20 = vmul.f32 0.015625, %v798_v19 }
 0x64a   :  { %v818_v21 = vpop.xlane.xlu1 %817 }
 0x64b   :  { %v832_v22 = vmul.f32 %v808_v20, %v808_v20  ;;  %v828_v23 = vmul.f32 0.015625, %v818_v21 }
 0x64d   :  { %v836_v24 = vsub.f32 %v828_v23, %v832_v22 }
 0x64e   :  { %v821_v25 = vpop.xlane.xlu0 %820  ;;  %v801_v26 = vpop.xlane.xlu1 %800 }
 0x64f   :  { %v844_v27 = vadd.f32 1e-05, %v836_v24  ;;  %v809_v28 = vmul.f32 0.015625, %v801_v26  ;;  %v829_v29 = vmul.f32 0.015625, %v821_v25 }
 0x651   :  { %2155 = vrsqrt.f32 %v844_v27  ;;  %v833_v30 = vmul.f32 %v809_v28, %v809_v28 }
 0x652   :  { %v804_v31 = vpop.xlane.xlu0 %803  ;;  %v824_v32 = vpop.xlane.xlu1 %823 }
 0x653   :  { %v837_v33 = vsub.f32 %v829_v29, %v833_v30  ;;  %v810_v34 = vmul.f32 0.015625, %v804_v31  ;;  %v830_v35 = vmul.f32 0.015625, %v824_v32 }
 0x655   :  { %v845_v36 = vadd.f32 1e-05, %v837_v33  ;;  %v834_v37 = vmul.f32 %v810_v34, %v810_v34 }
 0x656   :  { %v807_v38 = vpop.xlane.xlu0 %806 }
 0x657   :  { %2157 = vrsqrt.f32 %v845_v36  ;;  %v838_v39 = vsub.f32 %v830_v35, %v834_v37  ;;  %v811_v41 = vmul.f32 0.015625, %v807_v38 }
 0x659   :  { %v846_v42 = vadd.f32 1e-05, %v838_v39  ;;  %v835_v44 = vmul.f32 %v811_v41, %v811_v41 }
 0x65a   :  { %v827_v43 = vpop.xlane.xlu0 %826 }
 0x65b   :  { %2159 = vrsqrt.f32 %v846_v42  ;;  %v831_v45 = vmul.f32 0.015625, %v827_v43 }
 0x65d   :  { %v839_v47 = vsub.f32 %v831_v45, %v835_v44 }
 0x65e   :  { %v2156_v48 = vpop.eup %2155 }
 0x65f   :  { %v847_v51 = vadd.f32 1e-05, %v839_v47  ;;  %v852_v54 = vmul.f32 %v2156_v48, %v840_v46 }
 0x661   :  { %2161 = vrsqrt.f32 %v847_v51  ;;  %870 = vperm.xlu1 %1984, %v852_v54   ;;  %v860_v59 = vmul.f32 %v852_v54, %v808_v20 }
 0x663   :  { %v864_v0 = vsub.f32 %v856_v61, %v860_v59 }
 0x664   :  { %v2158_v56 = vpop.eup %2157 }
 0x665   :  { %v853_v58 = vmul.f32 %v2158_v56, %v841_v55 }
 0x667   :  { %875 = vperm.xlu0 %1985, %v853_v58   ;;  %v861_v40 = vmul.f32 %v853_v58, %v809_v28 }
 0x668   :  { %v2160_v62 = vpop.eup %2159 }
 0x669   :  { %v854_v63 = vmul.f32 %v2160_v62, %v842_v60  ;;  %v865_v9 = vsub.f32 %v857_v2, %v861_v40  ;;  %v2140_v2 = vld [vmem:[%s2860_s9 + $0x4] ss:$8 sps:$4 sm:$0xff]  }
 0x66b   :  { %880 = vperm.xlu1 %1984, %v854_v63   ;;  %894 = vperm.xlu0 %1985, %v864_v0   ;;  %v862_v6 = vmul.f32 %v854_v63, %v810_v34 }
 0x66d   :  { %v866_v10 = vsub.f32 %v858_v5, %v862_v6  ;;  %v2668_v5 = vand.u32 15, %v2340_v4 }
 0x66e   :  { %v2162_v11 = vpop.eup %2161 }
 0x66f   :  { %899 = vperm.xlu1 %1984, %v865_v9   ;;  %904 = vperm.xlu0 %1985, %v866_v10   ;;  %v855_v12 = vmul.f32 %v2162_v11, %v843_v7  ;;  %vm1142_vm4 = vcmp.ge.s32.totalorder %v2668_v5, 1  ;;  %vm1119_vm8 = vcmp.ge.s32.totalorder %v2668_v5, 2  ;;  %vm1096_vm10 = vcmp.ge.s32.totalorder %v2668_v5, 3 }
 0x670   :  { %vm2673_vm5 = vmpackc.low %vm1142_vm4, %vm1142_vm4  ;;  %vm1214_vm13 = vcmp.lt.s32.totalorder %v2668_v5, 13  ;;  %vm1190_vm15 = vcmp.lt.s32.totalorder %v2668_v5, 14  ;;  %vm1166_vm4 = vcmp.lt.s32.totalorder %v2668_v5, 15  ;;  %v2142_v5 = vld [vmem:[%s2860_s9] ss:$8 sps:$4 sm:$0xff]  }
 0x671   :  { %v863_v15 = vmul.f32 %v855_v12, %v811_v41  ;;  %vm2733_vm2 = vmpackc.low %vm1190_vm15, %vm1190_vm15 }
 0x673   :  { %885 = vperm.xlu1 %1984, %v855_v12   ;;  %v867_v49 = vsub.f32 %v859_v50, %v863_v15 }
 0x677   :  { %909 = vperm.xlu1 %1984, %v867_v49  }
 0x6dc   :  { %v871_v16 = vpop.permute.xlu1 %870 }
 0x6dd   :  { %v888_v20 = vmul.f32 %v871_v16, %v2578_v1 }
 0x6e2   :  { %v876_v17 = vpop.permute.xlu0 %875 }
 0x6e3   :  { %v889_v21 = vmul.f32 %v876_v17, %v2585_v8 }
 0x6e6   :  { %v881_v18 = vpop.permute.xlu1 %880  ;;  %v895_v19 = vpop.permute.xlu0 %894 }
 0x6e7   :  { %v912_v22 = vadd.f32 %v895_v19, %v888_v20  ;;  %v890_v29 = vmul.f32 %v881_v18, %v2592_v13 }
 0x6e9   :  { %v916_v25 = vmax.f32 %v912_v22, 0.0 }
 0x6ea   :  { %v900_v23 = vpop.permute.xlu1 %899  ;;  %v905_v27 = vpop.permute.xlu0 %904 }
 0x6eb   :  { %v913_v24 = vadd.f32 %v900_v23, %v889_v21  ;;  %v914_v31 = vadd.f32 %v905_v27, %v890_v29 }
 0x6ed   :  { %v917_v26 = vmax.f32 %v913_v24, 0.0  ;;  %v918_v8 = vmax.f32 %v914_v31, 0.0 }
 0x6ee   :  { %v886_v28 = vpop.permute.xlu1 %885 }
 0x6ef   :  { %v920_v30 = vpack.c.bf16 %v917_v26, %v916_v25  ;;  %v891_v32 = vmul.f32 %v886_v28, %v2599_v52 }
 0x6f1   :  { %995 = vrot.lane.b32.xlu0 %v920_v30, %s2215_s7  ;;  %1927 = vmatprep.mubr.msk.bf16.mxu1 %vm553_vm11, %v920_v30 }
 0x6f2   :  { %v910_v1 = vpop.permute.xlu1 %909 }
 0x6f3   :  { %v915_v33 = vadd.f32 %v910_v1, %v891_v32 }
 0x6f5   :  { %v919_v34 = vmax.f32 %v915_v33, 0.0 }
 0x6f7   :  { %v921_v35 = vpack.c.bf16 %v919_v34, %v918_v8 }
 0x6f9   :  { %997 = vrot.lane.b32.xlu1 %v921_v35, %s2215_s7  ;;  %1928 = vmatmul.mubr.msk.bf16.vlgmr.msra.gmra.mxu1 %vm553_vm11, %v921_v35 }
 0x6fa   :  { %1932 = vmatpush3.bf16.msra.mxu1 %v2138_v14 }
 0x6fb   :  { %1933 = vmatprep.subr.bf16.mxu1 %v2139_v53 }
 0x6fe   :  { %1934 = vmatpush3.bf16.msra.mxu1 %v2139_v53 }
 0x6ff   :  { %1263 = vmatprep.subr.bf16.mxu1 %v2212_v57 }
 0x763   :  { %v996_v13 = vpop.permute.xlu0 %995 }
 0x764   :  { %1935 = vmatprep.mubr.msk.bf16.mxu1 %vm553_vm11, %v996_v13 }
 0x76b   :  { %v998_v52 = vpop.permute.xlu1 %997 }
 0x76c   :  { %1936 = vmatmul.mubr.msk.bf16.vlgmr.msra.gmra.mxu1 %vm553_vm11, %v998_v52 }
 0x76d   :  { %1832 = vmatprep.mubr.msk.bf16.mxu1 %vm740_vm12, %v2140_v2 }
 0x7b9   :  { %v1929_v36 = vpop.f32.mrf.mxu1 }
 0x7bb   :  { %v978_v37 = vpop.f32.mrf.mxu1 }
 0x7bd   :  { %v1930_v38 = vpop.f32.mrf.mxu1 }
 0x7bf   :  { %v981_v39 = vpop.f32.mrf.mxu1 }
 0x82c   :  { %v1937_v41 = vpop.f32.mrf.mxu1 }
 0x82e   :  { %v1039_v42 = vpop.f32.mrf.mxu1 }
 0x830   :  { %v1938_v43 = vpop.f32.mrf.mxu1 }
 0x831   :  { %v2056_v44 = vpack.i.bf16 %v1938_v43, %v1937_v41 }
 0x832   :  { %v1042_v45 = vpop.f32.mrf.mxu1 }
 0x833   :  { %v2061_v46 = vpack.i.bf16 %v1042_v45, %v1039_v42  ;;  %2057 = vrot.lane.b32.xlu0 %v2056_v44, %s2216_s8 }
 0x835   :  { %2062 = vrot.lane.b32.xlu1 %v2061_v46, %s2216_s8 }
 0x8a5   :  { %v2058_v47 = vpop.permute.xlu0 %2057 }
 0x8a6   :  { %v2060_v48 = vunpack.i.h.bf16 %v2058_v47  ;;  %v2059_v51 = vunpack.i.l.bf16 %v2058_v47 }
 0x8a7   :  { %v2063_v54 = vpop.permute.xlu1 %2062 }
 0x8a8   :  { %v1074_v55 = vsel %vm1070_vm0, %v1930_v38, %v2060_v48  ;;  %v1073_v56 = vsel %vm1070_vm0, %v1929_v36, %v2059_v51  ;;  %v2065_v58 = vunpack.i.h.bf16 %v2063_v54  ;;  %v2064_v59 = vunpack.i.l.bf16 %v2063_v54 }
 0x8a9   :  { %v2066_v60 = vpack.i.bf16 %v1074_v55, %v1073_v56  ;;  %v1228_v61 = vpack.c.bf16 %v1074_v55, %v1073_v56 }
 0x8aa   :  { %v1072_v62 = vsel %vm1070_vm0, %v981_v39, %v2065_v58  ;;  %v1071_v40 = vsel %vm1070_vm0, %v978_v37, %v2064_v59 }
 0x8ab   :  { %2067 = vrot.lane.b32.xlu0 %v2066_v60, %s2204_s17  ;;  %1264 = vmatpush1.bf16.msra.mxu1 %v1228_v61  ;;  %v2071_v63 = vpack.i.bf16 %v1072_v62, %v1071_v40  ;;  %v1227_v0 = vpack.c.bf16 %v1072_v62, %v1071_v40 }
 0x8ac   :  { %1265 = vmatprep.subr.bf16.mxu1 %v2212_v57 }
 0x8ad   :  { %2072 = vrot.lane.b32.xlu1 %v2071_v63, %s2204_s17 }
 0x8af   :  { %2077 = vrot.lane.b32.xlu0 %v2066_v60, %s2205_s18  ;;  %1266 = vmatpush1.bf16.msra.mxu1 %v1227_v0 }
 0x8b0   :  { %1267 = vmatprep.subr.bf16.mxu1 %v2212_v57 }
 0x8b1   :  { %2082 = vrot.lane.b32.xlu1 %v2071_v63, %s2205_s18 }
 0x8b3   :  { %2087 = vrot.lane.b32.xlu0 %v2066_v60, %s2206_s19 }
 0x8b5   :  { %2092 = vrot.lane.b32.xlu1 %v2071_v63, %s2206_s19 }
 0x8b7   :  { %2097 = vrot.lane.b32.xlu0 %v2066_v60, %s2200_s29 }
 0x8b9   :  { %2102 = vrot.lane.b32.xlu1 %v2071_v63, %s2200_s29 }
 0x8bb   :  { %2107 = vrot.lane.b32.xlu0 %v2066_v60, %s2203_s0 }
 0x8bd   :  { %2112 = vrot.lane.b32.xlu1 %v2071_v63, %s2203_s0 }
 0x8bf   :  { %2117 = vrot.lane.b32.xlu0 %v2066_v60, %s2202_s30 }
 0x8c1   :  { %2122 = vrot.lane.b32.xlu1 %v2071_v63, %s2202_s30 }
 0x91d   :  { %v2068_v6 = vpop.permute.xlu0 %2067 }
 0x91e   :  { %v2070_v7 = vunpack.i.h.bf16 %v2068_v6  ;;  %v2069_v9 = vunpack.i.l.bf16 %v2068_v6 }
 0x91f   :  { %v2073_v10 = vpop.permute.xlu1 %2072 }
 0x920   :  { %v1141_v11 = vsel %vm119_vm1, 0.0, %v2070_v7  ;;  %v1140_v12 = vsel %vm119_vm1, 0.0, %v2069_v9  ;;  %v2075_v14 = vunpack.i.h.bf16 %v2073_v10  ;;  %v2074_v15 = vunpack.i.l.bf16 %v2073_v10 }
 0x921   :  { %v1797_v49 = vpack.c.bf16 %v1141_v11, %v1140_v12  ;;  %v2078_v53 = vpop.permute.xlu0 %2077 }
 0x922   :  { %v1139_v4 = vsel %vm119_vm1, 0.0, %v2075_v14  ;;  %v1138_v16 = vsel %vm119_vm1, 0.0, %v2074_v15  ;;  %v2080_v17 = vunpack.i.h.bf16 %v2078_v53  ;;  %v2079_v18 = vunpack.i.l.bf16 %v2078_v53  ;;  %vm2688_vm1 = vmpackc.low %vm1119_vm8, %vm1119_vm8 }
 0x923   :  { %v2083_v19 = vpop.permute.xlu1 %2082  ;;  %1798 = vmatpush1.bf16.msk.msra.mxu1 %vm2673_vm5, %v1797_v49  ;;  %v1800_v20 = vpack.c.bf16 %v1139_v4, %v1138_v16  ;;  %vm1695_vm8 = vcmask 8192  }
 0x924   :  { %1269 = vmatprep.subr.bf16.mxu1 %v2212_v57  ;;  %v1118_v21 = vsel %vm110_vm6, 0.0, %v2080_v17  ;;  %v1117_v22 = vsel %vm110_vm6, 0.0, %v2079_v18  ;;  %v2085_v23 = vunpack.i.h.bf16 %v2083_v19  ;;  %v2084_v24 = vunpack.i.l.bf16 %v2083_v19 }
 0x925   :  { %v2088_v25 = vpop.permute.xlu0 %2087  ;;  %v1803_v27 = vpack.c.bf16 %v1118_v21, %v1117_v22  ;;  %v2145_v21 = vld [vmem:[%s2860_s9 + $0x10] ss:$8 sps:$4 sm:$0xff]  }
 0x926   :  { %v1116_v28 = vsel %vm110_vm6, 0.0, %v2085_v23  ;;  %v1115_v29 = vsel %vm110_vm6, 0.0, %v2084_v24  ;;  %v2090_v30 = vunpack.i.h.bf16 %v2088_v25  ;;  %v2089_v31 = vunpack.i.l.bf16 %v2088_v25  ;;  %vm2703_vm6 = vmpackc.low %vm1096_vm10, %vm1096_vm10 }
 0x927   :  { %1801 = vmatpush1.bf16.msk.msra.mxu1 %vm2673_vm5, %v1800_v20  ;;  %v2093_v32 = vpop.permute.xlu1 %2092  ;;  %v1806_v1 = vpack.c.bf16 %v1116_v28, %v1115_v29  ;;  %vm1826_vm5 = vmpackc.low %vm1166_vm4, %vm1166_vm4  ;;  %v2143_v20 = vld [vmem:[%s2860_s9 + $0x14] ss:$8 sps:$4 sm:$0xff]  }
 0x928   :  { %1271 = vmatprep.subr.bf16.mxu1 %v2212_v57  ;;  %v1095_v33 = vsel %vm101_vm7, 0.0, %v2090_v30  ;;  %v1094_v8 = vsel %vm101_vm7, 0.0, %v2089_v31  ;;  %v2095_v34 = vunpack.i.h.bf16 %v2093_v32  ;;  %v2094_v35 = vunpack.i.l.bf16 %v2093_v32 }
 0x929   :  { %v2098_v13 = vpop.permute.xlu0 %2097  ;;  %v1809_v36 = vpack.c.bf16 %v1095_v33, %v1094_v8 }
 0x92a   :  { %v1093_v37 = vsel %vm101_vm7, 0.0, %v2095_v34  ;;  %v1092_v38 = vsel %vm101_vm7, 0.0, %v2094_v35  ;;  %v2100_v39 = vunpack.i.h.bf16 %v2098_v13  ;;  %v2099_v41 = vunpack.i.l.bf16 %v2098_v13  ;;  %vm2718_vm7 = vmpackc.low %vm1214_vm13, %vm1214_vm13 }
 0x92b   :  { %1804 = vmatpush1.bf16.msk.msra.mxu1 %vm2688_vm1, %v1803_v27  ;;  %v2103_v42 = vpop.permute.xlu1 %2102  ;;  %v1812_v43 = vpack.c.bf16 %v1093_v37, %v1092_v38 }
 0x92c   :  { %1273 = vmatprep.subr.bf16.mxu1 %v2212_v57  ;;  %v1213_v44 = vsel %vm1209_vm9, %v2100_v39, 0.0  ;;  %v1212_v45 = vsel %vm1209_vm9, %v2099_v41, 0.0  ;;  %v2105_v46 = vunpack.i.h.bf16 %v2103_v42  ;;  %v2104_v47 = vunpack.i.l.bf16 %v2103_v42 }
 0x92d   :  { %v2108_v48 = vpop.permute.xlu0 %2107  ;;  %v1815_v54 = vpack.c.bf16 %v1213_v44, %v1212_v45 }
 0x92e   :  { %v1211_v55 = vsel %vm1209_vm9, %v2105_v46, 0.0  ;;  %v1210_v56 = vsel %vm1209_vm9, %v2104_v47, 0.0  ;;  %v2110_v58 = vunpack.i.h.bf16 %v2108_v48  ;;  %v2109_v59 = vunpack.i.l.bf16 %v2108_v48 }
 0x92f   :  { %1807 = vmatpush1.bf16.msk.msra.mxu1 %vm2688_vm1, %v1806_v1  ;;  %v2113_v60 = vpop.permute.xlu1 %2112  ;;  %v1818_v61 = vpack.c.bf16 %v1211_v55, %v1210_v56 }
 0x930   :  { %1275 = vmatprep.subr.bf16.mxu1 %v2212_v57  ;;  %v1189_v62 = vsel %vm1185_vm14, %v2110_v58, 0.0  ;;  %v1188_v40 = vsel %vm1185_vm14, %v2109_v59, 0.0  ;;  %v2115_v63 = vunpack.i.h.bf16 %v2113_v60  ;;  %v2114_v0 = vunpack.i.l.bf16 %v2113_v60 }
 0x931   :  { %v2118_v2 = vpop.permute.xlu0 %2117  ;;  %v1821_v7 = vpack.c.bf16 %v1189_v62, %v1188_v40 }
 0x932   :  { %v1187_v9 = vsel %vm1185_vm14, %v2115_v63, 0.0  ;;  %v1186_v10 = vsel %vm1185_vm14, %v2114_v0, 0.0  ;;  %v2120_v11 = vunpack.i.h.bf16 %v2118_v2  ;;  %v2119_v12 = vunpack.i.l.bf16 %v2118_v2 }
 0x933   :  { %1810 = vmatpush1.bf16.msk.msra.mxu1 %vm2703_vm6, %v1809_v36  ;;  %v2123_v14 = vpop.permute.xlu1 %2122  ;;  %v1824_v15 = vpack.c.bf16 %v1187_v9, %v1186_v10  ;;  %v1356_v9 = vld [vmem:[%s2861_s10] sm:$0xff] }
 0x934   :  { %1277 = vmatprep.subr.bf16.mxu1 %v2212_v57  ;;  %v1165_v50 = vsel %vm1161_vm3, %v2120_v11, 0.0  ;;  %v1164_v49 = vsel %vm1161_vm3, %v2119_v12, 0.0  ;;  %v2125_v53 = vunpack.i.h.bf16 %v2123_v14  ;;  %v2124_v4 = vunpack.i.l.bf16 %v2123_v14 }
 0x935   :  { %v1827_v16 = vpack.c.bf16 %v1165_v50, %v1164_v49 }
 0x936   :  { %v1163_v17 = vsel %vm1161_vm3, %v2125_v53, 0.0  ;;  %v1162_v18 = vsel %vm1161_vm3, %v2124_v4, 0.0  ;;  %v1358_v4 = vld [vmem:[%s2861_s10 + $0x10] sm:$0xff] }
 0x937   :  { %1813 = vmatpush1.bf16.msk.msra.mxu1 %vm2703_vm6, %v1812_v43  ;;  %v1830_v19 = vpack.c.bf16 %v1163_v17, %v1162_v18 }
 0x938   :  { %1283 = vmatprep.subr.bf16.mxu1 %v2212_v57 }
 0x93b   :  { %1816 = vmatpush2.bf16.msk.msra.mxu1 %vm2718_vm7, %v1815_v54 }
 0x93c   :  { %1285 = vmatprep.subr.bf16.mxu1 %v2212_v57 }
 0x93f   :  { %1819 = vmatpush2.bf16.msk.msra.mxu1 %vm2718_vm7, %v1818_v61 }
 0x940   :  { %1287 = vmatprep.subr.bf16.mxu1 %v2212_v57 }
 0x943   :  { %1822 = vmatpush2.bf16.msk.msra.mxu1 %vm2733_vm2, %v1821_v7 }
 0x944   :  { %1289 = vmatprep.subr.bf16.mxu1 %v2212_v57 }
 0x947   :  { %1825 = vmatpush2.bf16.msk.msra.mxu1 %vm2733_vm2, %v1824_v15  ;;  %v1357_v15 = vld [vmem:[%s2861_s10 + $0x8] sm:$0xff] }
 0x948   :  { %1291 = vmatprep.subr.bf16.mxu1 %v2212_v57 }
 0x94b   :  { %1828 = vmatpush2.bf16.msk.msra.mxu1 %vm1826_vm5, %v1827_v16  ;;  %v1372_v16 = vld [vmem:[%s2862_s11] sm:$0xff] }
 0x94c   :  { %1293 = vmatprep.subr.bf16.mxu1 %v2212_v57 }
 0x94f   :  { %1831 = vmatpush2.bf16.msk.msra.mxu1 %vm1826_vm5, %v1830_v19 }
 0x952   :  { %1296 = vmatmul.mubr.bf16.vlgmr.msra.gmra.mxu1 %v2142_v5 }
 0x953   :  { %1833 = vmatprep.mubr.msk.bf16.mxu1 %vm740_vm12, %v2143_v20  ;;  %v1373_v20 = vld [vmem:[%s2862_s11 + $0x8] sm:$0xff]  ;;  %vm1578_vm12 = vcmask 64512  }
 0x95a   :  { %1304 = vmatmul.mubr.bf16.gmra.mxu1 %v2145_v21  ;;  %v1374_v21 = vld [vmem:[%s2862_s11 + $0x10] sm:$0xff] }
 0xa12   :  { %v2757_v22 = vpop.f32.mrf.mxu1 }
 0xa13   :  { %v1312_v57 = vsel %vm553_vm11, %v2757_v22, 0.0  ;;  %v1328_v23 = vmul.f32 %v2757_v22, %v2757_v22 }
 0xa14   :  { %1313 = vadd.xlane.f32.xlu0 %v1312_v57  ;;  %v1299_v24 = vpop.f32.mrf.mxu1 }
 0xa15   :  { %v1332_v25 = vsel %vm553_vm11, %v1328_v23, 0.0  ;;  %v1359_v23 = vld [vmem:[%s2861_s10 + $0x18] sm:$0xff]  ;;  %s2217_s10 = smov 112  }
 0xa16   :  { %1333 = vadd.xlane.f32.xlu1 %v1332_v25  ;;  %v2764_v26 = vpop.f32.mrf.mxu1 }
 0xa17   :  { %v1329_v27 = vmul.f32 %v2764_v26, %v2764_v26  ;;  %v1315_v30 = vsel %vm553_vm11, %v2764_v26, 0.0 }
 0xa18   :  { %v1302_v28 = vpop.f32.mrf.mxu1 }
 0xa19   :  { %v1335_v29 = vsel %vm553_vm11, %v1329_v27, 0.0 }
 0xa1a   :  { %1336 = vadd.xlane.f32.xlu0 %v1335_v29  ;;  %1316 = vadd.xlane.f32.xlu1 %v1315_v30  ;;  %v2771_v31 = vpop.f32.mrf.mxu1  ;;  %v1375_v30 = vld [vmem:[%s2862_s11 + $0x18] sm:$0xff]  ;;  %s2218_s11 = smov 8  }
 0xa1b   :  { %v1318_v32 = vsel %vm553_vm11, %v2771_v31, 0.0  ;;  %v1330_v1 = vmul.f32 %v2771_v31, %v2771_v31 }
 0xa1c   :  { %v1307_v33 = vpop.f32.mrf.mxu1 }
 0xa1d   :  { %v1338_v8 = vsel %vm553_vm11, %v1330_v1, 0.0  ;;  %v2146_v1 = vld [vmem:[%s2863_s12] sm:$0xff]  }
 0xa1e   :  { %1319 = vadd.xlane.f32.xlu0 %v1318_v32  ;;  %v2778_v34 = vpop.f32.mrf.mxu1  ;;  %1339 = vadd.xlane.f32.xlu1 %v1338_v8 }
 0xa1f   :  { %v1321_v13 = vsel %vm553_vm11, %v2778_v34, 0.0  ;;  %v1331_v52 = vmul.f32 %v2778_v34, %v2778_v34  ;;  %1939 = vmatprep.subr.bf16.mxu0 %v2146_v1 }
 0xa20   :  { %v1310_v35 = vpop.f32.mrf.mxu1  ;;  %1940 = vmatpush3.bf16.msra.mxu0 %v2146_v1 }
 0xa21   :  { %v1341_v36 = vsel %vm553_vm11, %v1331_v52, 0.0  ;;  %1945 = vmatprep.subr.bf16.mxu0 %v2146_v1  ;;  %vm2220_vm11 = vmmov 0  }
 0xa22   :  { %1322 = vadd.xlane.f32.xlu0 %v1321_v13 }
 0xa26   :  { %1342 = vadd.xlane.f32.xlu0 %v1341_v36 }
 0xa9d   :  { %v1314_v37 = vpop.xlane.xlu0 %1313 }
 0xa9e   :  { %v1324_v38 = vmul.f32 0.03125, %v1314_v37 }
 0xa9f   :  { %v1334_v39 = vpop.xlane.xlu1 %1333 }
 0xaa0   :  { %v1348_v41 = vmul.f32 %v1324_v38, %v1324_v38  ;;  %v1344_v42 = vmul.f32 0.03125, %v1334_v39 }
 0xaa2   :  { %v1352_v43 = vsub.f32 %v1344_v42, %v1348_v41 }
 0xaa3   :  { %v1337_v44 = vpop.xlane.xlu0 %1336  ;;  %v1317_v45 = vpop.xlane.xlu1 %1316 }
 0xaa4   :  { %v1360_v46 = vadd.f32 1e-05, %v1352_v43  ;;  %v1325_v47 = vmul.f32 0.03125, %v1317_v45  ;;  %v1345_v48 = vmul.f32 0.03125, %v1337_v44 }
 0xaa6   :  { %2163 = vrsqrt.f32 %v1360_v46  ;;  %v1349_v51 = vmul.f32 %v1325_v47, %v1325_v47 }
 0xaa7   :  { %v1320_v54 = vpop.xlane.xlu0 %1319  ;;  %v1340_v55 = vpop.xlane.xlu1 %1339 }
 0xaa8   :  { %v1353_v56 = vsub.f32 %v1345_v48, %v1349_v51  ;;  %v1326_v58 = vmul.f32 0.03125, %v1320_v54  ;;  %v1346_v59 = vmul.f32 0.03125, %v1340_v55 }
 0xaaa   :  { %v1361_v60 = vadd.f32 1e-05, %v1353_v56  ;;  %v1350_v61 = vmul.f32 %v1326_v58, %v1326_v58 }
 0xaab   :  { %v1323_v62 = vpop.xlane.xlu0 %1322 }
 0xaac   :  { %2165 = vrsqrt.f32 %v1361_v60  ;;  %v1354_v40 = vsub.f32 %v1346_v59, %v1350_v61  ;;  %v1327_v63 = vmul.f32 0.03125, %v1323_v62 }
 0xaae   :  { %v1362_v0 = vadd.f32 1e-05, %v1354_v40  ;;  %v1351_v6 = vmul.f32 %v1327_v63, %v1327_v63 }
 0xaaf   :  { %v1343_v2 = vpop.xlane.xlu0 %1342 }
 0xab0   :  { %2167 = vrsqrt.f32 %v1362_v0  ;;  %v1347_v7 = vmul.f32 0.03125, %v1343_v2  ;;  %v1606_v0 = vld [vmem:[#allocation2] sm:$0x1]  ;;  %v1605_v2 = vld [vmem:[%s2866_s15 + $0x8] sm:$0xff] }
 0xab2   :  { %v1355_v10 = vsub.f32 %v1347_v7, %v1351_v6  ;;  %v2219_v6 = vmov 0.0   ;;  %v1604_v7 = vld [vmem:[%s2866_s15] sm:$0xff] }
 0xab3   :  { %v2164_v11 = vpop.eup %2163 }
 0xab4   :  { %v1363_v12 = vadd.f32 1e-05, %v1355_v10  ;;  %v1368_v14 = vmul.f32 %v2164_v11, %v1356_v9  ;;  %v1583_v10 = vld [vmem:[%s2864_s13] sm:$0xff] }
 0xab6   :  { %2169 = vrsqrt.f32 %v1363_v12  ;;  %1386 = vperm.xlu1 %1984, %v1368_v14   ;;  %v1376_v53 = vmul.f32 %v1368_v14, %v1324_v38  ;;  %v1585_v12 = vld [vmem:[%s2864_s13 + $0x10] sm:$0xff]  ;;  %v1584_v14 = vld [vmem:[%s2864_s13 + $0x8] sm:$0xff] }
 0xab8   :  { %v1380_v5 = vsub.f32 %v1372_v16, %v1376_v53 }
 0xab9   :  { %v2166_v50 = vpop.eup %2165 }
 0xaba   :  { %v1369_v49 = vmul.f32 %v2166_v50, %v1357_v15 }
 0xabc   :  { %1391 = vperm.xlu0 %1985, %v1369_v49   ;;  %v1377_v18 = vmul.f32 %v1369_v49, %v1325_v47 }
 0xabd   :  { %v2168_v17 = vpop.eup %2167 }
 0xabe   :  { %v1370_v19 = vmul.f32 %v2168_v17, %v1358_v4  ;;  %v1381_v24 = vsub.f32 %v1373_v20, %v1377_v18  ;;  %v1586_v18 = vld [vmem:[%s2864_s13 + $0x18] sm:$0xff]  ;;  %s2221_s13 = smov [#allocation3]  }
 0xabf   :  { %s1703_s14 = sshll.u32 %s2221_s13, 4  ;;  %s1704_s14 = int_to_ptr.vmem [resolvable:$true] %s1703_s14 }
 0xac0   :  { %1396 = vperm.xlu1 %1984, %v1370_v19   ;;  %1410 = vperm.xlu0 %1985, %v1380_v5   ;;  %v1378_v57 = vmul.f32 %v1370_v19, %v1326_v58  ;;  %s2175_s2 = scalar_lea.vmem %s1704_s14, 16  ;;  %s2179_s20 = scalar_lea.vmem %s1704_s14, 32 }
 0xac1   :  { %p2176_p0 = scmp.ne.s32.totalorder %s1704_s14, %s2175_s2  ;;  %p2180_p1 = scmp.lt.s32.totalorder %s1704_s14, %s1704_s14 }
 0xac2   :  { %v1382_v25 = vsub.f32 %v1374_v21, %v1378_v57  ;;  %p2181_p2 = scmp.lt.s32.totalorder %s2179_s20, %s2175_s2 }
 0xac3   :  { %v2170_v27 = vpop.eup %2169 }
 0xac4   :  { %1415 = vperm.xlu1 %1984, %v1381_v24   ;;  %1420 = vperm.xlu0 %1985, %v1382_v25   ;;  %v1371_v28 = vmul.f32 %v2170_v27, %v1359_v23  ;;  %p2182_p3 = por %p2181_p2, %p2180_p1 }
 0xac6   :  { %v1379_v29 = vmul.f32 %v1371_v28, %v1327_v63  ;;  %p2183_p4 = pnand %p2182_p3, %p2176_p0 }
 0xac8   :  { %1401 = vperm.xlu1 %1984, %v1371_v28   ;;  %v1383_v32 = vsub.f32 %v1375_v30, %v1379_v29 }
 0xacc   :  { %1425 = vperm.xlu1 %1984, %v1383_v32  }
 0xb31   :  { %v1387_v33 = vpop.permute.xlu1 %1386 }
 0xb32   :  { %v1404_v52 = vmul.f32 %v1387_v33, %v2757_v22 }
 0xb37   :  { %v1392_v8 = vpop.permute.xlu0 %1391 }
 0xb38   :  { %v1405_v36 = vmul.f32 %v1392_v8, %v2764_v26 }
 0xb3b   :  { %v1397_v35 = vpop.permute.xlu1 %1396  ;;  %v1411_v13 = vpop.permute.xlu0 %1410 }
 0xb3c   :  { %v1428_v37 = vadd.f32 %v1411_v13, %v1404_v52  ;;  %v1406_v45 = vmul.f32 %v1397_v35, %v2771_v31  ;;  %v1613_v35 = vshrl.u32 %v58_v3, 7 }
 0xb3e   :  { %v1432_v41 = vmax.f32 %v1428_v37, 0.0  ;;  %v1614_v13 = vsub.s32 0, %v1613_v35 }
 0xb3f   :  { %v1416_v38 = vpop.permute.xlu1 %1415  ;;  %v1421_v43 = vpop.permute.xlu0 %1420 }
 0xb40   :  { %v1429_v39 = vadd.f32 %v1416_v38, %v1405_v36  ;;  %v1430_v47 = vadd.f32 %v1421_v43, %v1406_v45 }
 0xb42   :  { %v1433_v42 = vmax.f32 %v1429_v39, 0.0  ;;  %v1434_v26 = vmax.f32 %v1430_v47, 0.0 }
 0xb43   :  { %v1402_v44 = vpop.permute.xlu1 %1401 }
 0xb44   :  { %v1436_v46 = vpack.c.bf16 %v1433_v42, %v1432_v41  ;;  %v1407_v48 = vmul.f32 %v1402_v44, %v2778_v34 }
 0xb46   :  { %1503 = vrot.lane.b32.xlu0 %v1436_v46, %s2217_s10  ;;  %1941 = vmatprep.mubr.msk.bf16.mxu0 %vm1070_vm0, %v1436_v46 }
 0xb47   :  { %v1426_v22 = vpop.permute.xlu1 %1425 }
 0xb48   :  { %v1431_v51 = vadd.f32 %v1426_v22, %v1407_v48 }
 0xb4a   :  { %v1435_v54 = vmax.f32 %v1431_v51, 0.0 }
 0xb4c   :  { %v1437_v55 = vpack.c.bf16 %v1435_v54, %v1434_v26 }
 0xb4e   :  { %1505 = vrot.lane.b32.xlu1 %v1437_v55, %s2217_s10  ;;  %1942 = vmatmul.mubr.msk.bf16.vlgmr.msra.gmra.mxu0 %vm1070_vm0, %v1437_v55 }
 0xb4f   :  { %1946 = vmatpush3.bf16.msra.mxu0 %v2146_v1 }
 0xb50   :  { %1951 = vmatprep.subr.mxu0 %v2219_v6 }
 0xbb8   :  { %v1504_v56 = vpop.permute.xlu0 %1503 }
 0xbb9   :  { %1947 = vmatprep.mubr.msk.bf16.mxu0 %vm1070_vm0, %v1504_v56 }
 0xbc0   :  { %v1506_v31 = vpop.permute.xlu1 %1505 }
 0xbc1   :  { %1948 = vmatmul.mubr.msk.bf16.vlgmr.msra.gmra.mxu0 %vm1070_vm0, %v1506_v31 }
 0xbc2   :  { %1955 = vmatprep.mubr.msk.f32.mxu0 %vm2220_vm11, %v2219_v6  ;;  %1952 = vmatpush3.msra.mxu0 %v1605_v2 }
 0xbc3   :  { %1953 = vmatprep.subr.mxu0 %v2219_v6 }
 0xbc4   :  { %1954 = vmatpush3.msra.mxu0 %v1604_v7 }
 0xc0e   :  { %v1943_v34 = vpop.f32.mrf.mxu0 }
 0xc10   :  { %v1486_v58 = vpop.f32.mrf.mxu0 }
 0xc12   :  { %v1944_v59 = vpop.f32.mrf.mxu0 }
 0xc14   :  { %v1489_v60 = vpop.f32.mrf.mxu0 }
 0xc81   :  { %v1949_v61 = vpop.f32.mrf.mxu0 }
 0xc83   :  { %v1547_v62 = vpop.f32.mrf.mxu0 }
 0xc84   :  { %1566 = vrot.lane.b32.xlu0 %v1547_v62, %s2218_s11 }
 0xc85   :  { %v1950_v40 = vpop.f32.mrf.mxu0 }
 0xc87   :  { %v1550_v63 = vpop.f32.mrf.mxu0 }
 0xc88   :  { %1570 = vrot.lane.b32.xlu0 %v1949_v61, %s2218_s11  ;;  %1568 = vrot.lane.b32.xlu1 %v1550_v63, %s2218_s11 }
 0xc8c   :  { %1609 = vperm.xlu0 %1985, %v1606_v0   ;;  %1572 = vrot.lane.b32.xlu1 %v1950_v40, %s2218_s11 }
 0xcf6   :  { %v1567_v9 = vpop.permute.xlu0 %1566 }
 0xcf7   :  { %v1579_v11 = vsel %vm1578_vm12, %v1486_v58, %v1567_v9 }
 0xcf8   :  { %v1587_v15 = vmul.f32 %v1583_v10, %v1579_v11 }
 0xcfa   :  { %v1571_v50 = vpop.permute.xlu0 %1570  ;;  %v1569_v49 = vpop.permute.xlu1 %1568  ;;  %v1591_v19 = vsel %vm1070_vm0, %v1587_v15, 0.0 }
 0xcfb   :  { %v1581_v53 = vsel %vm1578_vm12, %v1943_v34, %v1571_v50  ;;  %v1580_v4 = vsel %vm1578_vm12, %v1489_v60, %v1569_v49 }
 0xcfc   :  { %v1589_v16 = vmul.f32 %v1585_v12, %v1581_v53  ;;  %v1588_v17 = vmul.f32 %v1584_v14, %v1580_v4 }
 0xcfe   :  { %v1592_v5 = vsel %vm1070_vm0, %v1588_v17, 0.0  ;;  %v1573_v20 = vpop.permute.xlu1 %1572  ;;  %v1594_v23 = vsel %vm1070_vm0, %v1589_v16, 0.0 }
 0xcff   :  { %v1593_v21 = vadd.f32 %v1592_v5, %v1591_v19  ;;  %v1582_v57 = vsel %vm1578_vm12, %v1944_v59, %v1573_v20 }
 0xd00   :  { %v1590_v24 = vmul.f32 %v1586_v18, %v1582_v57 }
 0xd01   :  { %v1595_v25 = vadd.f32 %v1594_v23, %v1593_v21 }
 0xd02   :  { %v1596_v27 = vsel %vm1070_vm0, %v1590_v24, 0.0 }
 0xd03   :  { %v1597_v28 = vadd.f32 %v1596_v27, %v1595_v25 }
 0xd05   :  { %v1598_v29 = vrot.slane %v1597_v28, 4 }
 0xd07   :  { %v1599_v30 = vadd.f32 %v1598_v29, %v1597_v28  ;;  %v1610_v52 = vpop.permute.xlu0 %1609 }
 0xd08   :  { %v1615_v36 = vrot.slane %v1610_v52, %v1614_v13 }
 0xd09   :  { %v1600_v32 = vrot.slane %v1599_v30, 2 }
 0xd0b   :  { %v1601_v1 = vadd.f32 %v1600_v32, %v1599_v30 }
 0xd0d   :  { %v1602_v33 = vrot.slane %v1601_v1, 1 }
 0xd0f   :  { %v1603_v8 = vadd.f32 %v1602_v33, %v1601_v1 }
 0xd11   :  { %1956 = vmatmul.mubr.msk.f32.vlgmr.msra.gmra.mxu0 %vm1070_vm0, %v1603_v8 }
 0xdd1   :  { %v1685_v37 = vpop.f32.mrf.mxu0 }
 0xdd2   :  { %v1686_v38 = vadd.f32 %v1685_v37, %v1615_v36 }
 0xdd3   :  { %v1957_v39 = vpop.f32.mrf.mxu0 }
 0xdd4   :  { %v1689_v41 = vsub.f32 0.0, %v1686_v38 }
 0xdd6   :  { %v1690_v42 = vmul.f32 1.442695, %v1689_v41 }
 0xdd8   :  { %2171 = vpow2.f32 %v1690_v42 }
 0xde5   :  { %v2172_v43 = vpop.eup %2171 }
 0xde6   :  { %v1692_v44 = vadd.f32 1.0, %v2172_v43 }
 0xde8   :  { %2173 = vrcp.f32 %v1692_v44 }
 0xdf5   :  { %v2174_v45 = vpop.eup %2173 }
 0xdf6   :  { %1696 = vst.msk [vmem:[#allocation3] sm:$0x1] %vm1695_vm8, %v2174_v45 }
 0xdf7   :  { %2186 = shalt.err (!%p2183_p4)
}
 0xdf8   :  { %1706 = dma.vmem_to_hbm [thread:$0]  %s1704_s14, 16, %s2867_s16, [#allocation4]  }
 0xdf9   :  { %2195 = dma.done.wait [#allocation4], 16  }
 0xdfa   :  { %2196 = vsyncadd [#allocation4], 4294967280 }
 0xdfb   :  { %1710 = vsyncpa [#allocation4], 1 }

</bundles_post_ra>
